<compile_context>
chip_gen: v6e
topology: v6e:2x2x1
jax: 0.10.0
libtpu: 0.0.40
codegen_flags: <defaults>
</compile_context>

<pallas_src>
import numpy as np
import jax
import jax.numpy as jnp
from jax.experimental import pallas as pl
from jax.experimental.pallas import tpu as pltpu  # noqa: F401  (TPU target)

# ----------------------------- config -----------------------------------------
B, S, H, FFN, V, T = 2, 8, 32, 64, 100, 5
PAD_TOKEN_ID = 1
TAG_TO_ID = {'O': 0, 'B-PER': 1, 'I-PER': 2, 'B-LOC': 3, 'I-LOC': 4}
ID_TO_TAG = {v: k for k, v in TAG_TO_ID.items()}
NEG = -10000.0


# ----------------------------- fused Pallas kernel ------------------------------
def _fused_ner_kernel(emb_ref, mask_ref, mask_col_ref, tags_oh_ref, last_oh_ref,
                      wqkv_ref, bqkv_ref, wo_ref, w1_ref, b1_ref, w2_ref,
                      ff_w_ref, vecs_h_ref, vecs_t_ref, trans_ref,
                      scores_ref, loglik_ref):
    """Encoder layer + leaky_relu/linear head + CRF log-likelihood, whole batch.

    grid=(): single invocation, everything VMEM-resident. The B=2 batch is a
    tiny unrolled Python loop for the encoder/head (plain 2-D matmuls); the CRF
    forward recursion runs batched on (B, T).
    """
    # ---- unpack packed parameters (static slices of stacked arrays) ----
    vecs_h = vecs_h_ref[...]                                  # (6, H): bo|g1|c1|b2|g2|c2
    bo, g1, c1 = vecs_h[0:1, :], vecs_h[1:2, :], vecs_h[2:3, :]
    b2, g2, c2 = vecs_h[3:4, :], vecs_h[4:5, :], vecs_h[5:6, :]
    vecs_t = vecs_t_ref[...]                                  # (3, T): ff_b|crf_start|crf_end
    ff_b, start, end = vecs_t[0:1, :], vecs_t[1:2, :], vecs_t[2:3, :]

    wqkv = wqkv_ref[...]                                      # (H, 3H), 1/sqrt(H) folded into Q
    bqkv = bqkv_ref[...]                                      # (1, 3H)
    wo = wo_ref[...]
    w1 = w1_ref[...]
    b1 = b1_ref[...]
    w2 = w2_ref[...]
    ff_w = ff_w_ref[...]
    trans = trans_ref[...]                                    # (T, T)

    mask = mask_ref[...]                                      # (B, S) float
    attn_bias = (mask - 1.0) * 1e9                            # hoisted out of the per-batch loop

    # CRF transition prep for matmul-form logsumexp (hoisted out of the recursion)
    tmax = jnp.max(trans, keepdims=True)                      # (1, 1)
    exp_trans = jnp.exp(trans - tmax)                         # (T, T)

    numer = jnp.zeros((1, 1), jnp.float32)
    emis_list = []
    for bi in range(B):                                       # tiny unrolled batch loop (B=2)
        x = emb_ref[bi]                                       # (S, H)

        # ---- self-attention (fused QKV: one matmul instead of three) ----
        qkv = jnp.dot(x, wqkv, preferred_element_type=jnp.float32) + bqkv    # (S, 3H)
        q = qkv[:, 0:H]
        k = qkv[:, H:2 * H]
        v = qkv[:, 2 * H:3 * H]
        sc = jax.lax.dot_general(q, k, (((1,), (1,)), ((), ())),
                                 preferred_element_type=jnp.float32)         # (S, S)
        sc = sc + attn_bias[bi:bi + 1, :]                     # additive key mask
        sc = sc - jnp.max(sc, axis=-1, keepdims=True)
        p = jnp.exp(sc)
        p = p / jnp.sum(p, axis=-1, keepdims=True)
        ctx = jnp.dot(p, v, preferred_element_type=jnp.float32)              # (S, H)
        attn = jnp.dot(ctx, wo, preferred_element_type=jnp.float32) + bo
        h = x + attn
        mu = jnp.mean(h, axis=-1, keepdims=True)
        var = jnp.mean(jnp.square(h - mu), axis=-1, keepdims=True)
        h = (h - mu) * jax.lax.rsqrt(var + 1e-5) * g1 + c1

        # ---- FFN ----
        f = jnp.dot(h, w1, preferred_element_type=jnp.float32) + b1
        f = jax.nn.gelu(f)
        f = jnp.dot(f, w2, preferred_element_type=jnp.float32) + b2
        h2 = h + f
        mu2 = jnp.mean(h2, axis=-1, keepdims=True)
        var2 = jnp.mean(jnp.square(h2 - mu2), axis=-1, keepdims=True)
        h2 = (h2 - mu2) * jax.lax.rsqrt(var2 + 1e-5) * g2 + c2

        # ---- head: leaky_relu -> linear (token scores / CRF emissions) ----
        # TODO(synk): nn.Dropout omitted (inference semantics); torch RNG stream cannot be matched.
        a = jnp.where(h2 >= 0.0, h2, 0.01 * h2)               # F.leaky_relu (slope 0.01)
        emis = jnp.dot(a, ff_w, preferred_element_type=jnp.float32) + ff_b   # (S, T)
        scores_ref[bi] = emis                                 # single tiny store; never round-trips HBM for the CRF
        emis_list.append(emis)

        # ---- CRF gold-path score (numerator), accumulated over the batch ----
        tags_oh = tags_oh_ref[bi]                             # (S, T) one-hot gold tags
        mcol = mask_col_ref[bi]                               # (S, 1)
        emit_score = jnp.sum(emis * tags_oh * mcol, keepdims=True)
        trans_pair = jnp.dot(tags_oh[:-1, :], trans, preferred_element_type=jnp.float32)
        trans_score = jnp.sum(trans_pair * tags_oh[1:, :] * mcol[1:, :], keepdims=True)
        start_score = jnp.sum(start * tags_oh[0:1, :], keepdims=True)
        numer = numer + emit_score + trans_score + start_score
    numer = numer + jnp.sum(end * last_oh_ref[...], keepdims=True)           # end scores, batched

    # ---- CRF log-partition (denominator): batched forward recursion on (B, T) ----
    # Per-step (B,T) emission rows are assembled with broadcast-selects, which
    # avoids any lane<->sublane relayout / concatenate inside the serial loop.
    row_id = jax.lax.broadcasted_iota(jnp.int32, (B, 1), 0)
    sels = [(row_id == bi).astype(jnp.float32) for bi in range(B)]           # (B, 1) each

    def batch_rows(rows):                                     # rows: B arrays of shape (1, T)
        acc = sels[0] * rows[0]
        for bi in range(1, B):
            acc = acc + sels[bi] * rows[bi]
        return acc                                            # (B, T)

    alpha = start + batch_rows([emis_list[bi][0:1, :] for bi in range(B)])   # (B, T)
    for i in range(1, S):                                     # serial chain: S-1 steps (was B*(S-1))
        emis_i = batch_rows([emis_list[bi][i:i + 1, :] for bi in range(B)])  # (B, T)
        amax = jnp.max(alpha, axis=-1, keepdims=True)                        # (B, 1)
        # logsumexp_k(alpha[:,k] + trans[k,:]) as a batched (B,T)@(T,T) matmul.
        # (A pure-VPU form needs a per-step lane<->sublane relayout at T=5,
        #  which costs as much as this tiny MXU round-trip.)
        z = jnp.dot(jnp.exp(alpha - amax), exp_trans,
                    preferred_element_type=jnp.float32)                      # (B, T)
        new_alpha = amax + tmax + jnp.log(z) + emis_i
        m_i = mask[:, i:i + 1]                                               # (B, 1)
        alpha = m_i * new_alpha + (1.0 - m_i) * alpha
    stops = alpha + end                                                      # (B, T)
    smax = jnp.max(stops, axis=-1, keepdims=True)                            # (B, 1)
    denom = smax + jnp.log(jnp.sum(jnp.exp(stops - smax), axis=-1, keepdims=True))
    loglik_ref[...] = numer - jnp.sum(denom, keepdims=True)


# ----------------------------- pallas_call wrapper -------------------------------
def pack_params(p):
    """Pack params per the perf review: fused QKV (1/sqrt(H) folded into the Q
    block) and stacked (1,H)/(1,T) vectors -> fewer DMA descriptors & padded tiles."""
    inv_sqrt_h = 1.0 / float(np.sqrt(H))
    wqkv = jnp.concatenate([p['wq'] * inv_sqrt_h, p['wk'], p['wv']], axis=1)   # (H, 3H)
    bqkv = jnp.concatenate([p['bq'] * inv_sqrt_h, p['bk'], p['bv']], axis=1)   # (1, 3H)
    vecs_h = jnp.concatenate([p['bo'], p['g1'], p['c1'],
                              p['b2'], p['g2'], p['c2']], axis=0)              # (6, H)
    vecs_t = jnp.concatenate([p['ff_b'], p['crf_start'], p['crf_end']], axis=0)  # (3, T)
    return (wqkv, bqkv, p['wo'], p['w1'], p['b1'], p['w2'], p['ff_w'],
            vecs_h, vecs_t, p['crf_trans'])


def fused_forward(emb, mask_row, mask_col, tags_oh, last_oh, packed):
    # Single pallas_call, grid=(): one launch, whole working set in VMEM.
    # TODO(synk): at real XLM-R dims (H~1024, S~512, FFN=4H) re-introduce a grid
    # and K-tile w1/w2 for v7x's 64 MiB VMEM instead of whole-weight residency.
    return pl.pallas_call(
        _fused_ner_kernel,
        out_shape=(jax.ShapeDtypeStruct((B, S, T), jnp.float32),   # token_scores (for host Viterbi)
                   jax.ShapeDtypeStruct((1, 1), jnp.float32)),     # sum of CRF log-likelihoods
    )(emb, mask_row, mask_col, tags_oh, last_oh, *packed)


# ----------------------------- host-side glue -----------------------------------
def _bio_allowed(from_label, to_label):
    def split(lbl):
        if lbl in ('START', 'END', 'O'):
            return lbl, ''
        return lbl[0], lbl[2:]
    ft, fe = split(from_label)
    tt, te = split(to_label)
    if ft == 'START':
        return tt in ('O', 'B')
    if tt == 'END':
        return ft in ('O', 'B', 'I')
    return tt in ('O', 'B') or (tt == 'I' and ft in ('B', 'I') and fe == te)


def viterbi_decode(emissions, mask, trans, start, end):
    # TODO(synk): Viterbi backtracking is inherently sequential/host-side; kept in numpy glue.
    labels = [ID_TO_TAG[i] for i in range(T)]
    allowed = np.array([[_bio_allowed(a, b2) for b2 in labels] for a in labels])
    allowed_start = np.array([_bio_allowed('START', b2) for b2 in labels])
    allowed_end = np.array([_bio_allowed(a, 'END') for a in labels])
    ctrans = np.where(allowed, trans, NEG)
    cstart = np.where(allowed_start, start, NEG)
    cend = np.where(allowed_end, end, NEG)
    paths = []
    for b in range(emissions.shape[0]):
        L = int(mask[b].sum())
        e = emissions[b, :L]
        dp = np.zeros((L, T), dtype=np.float64)
        bp = np.zeros((L, T), dtype=np.int64)
        dp[0] = cstart + e[0]
        for t in range(1, L):
            cand = dp[t - 1][:, None] + ctrans
            bp[t] = cand.argmax(0)
            dp[t] = cand.max(0) + e[t]
        final = dp[L - 1] + cend
        tag = int(final.argmax())
        score = float(final.max())
        seq = [tag]
        for t in range(L - 1, 0, -1):
            tag = int(bp[t, tag])
            seq.append(tag)
        seq.reverse()
        paths.append((seq, score))
    return paths


def extract_spans(tag_strs):
    spans = {}
    cur_start, cur_type = None, None
    for i, t in enumerate(tag_strs):
        if t.startswith('B-'):
            if cur_start is not None:
                spans[(cur_start, i - 1)] = cur_type
            cur_start, cur_type = i, t[2:]
        elif t.startswith('I-') and cur_type == t[2:]:
            continue
        else:
            if cur_start is not None:
                spans[(cur_start, i - 1)] = cur_type
            cur_start, cur_type = None, None
    if cur_start is not None:
        spans[(cur_start, len(tag_strs) - 1)] = cur_type
    return spans


def span_f1(pred_list, gold_list):
    tp = fp = fn = 0
    for pred, gold in zip(pred_list, gold_list):
        for span, lbl in pred.items():
            if gold.get(span) == lbl:
                tp += 1
            else:
                fp += 1
        for span, lbl in gold.items():
            if pred.get(span) != lbl:
                fn += 1
    prec = tp / (tp + fp) if (tp + fp) else 0.0
    rec = tp / (tp + fn) if (tp + fn) else 0.0
    f1 = 2 * prec * rec / (prec + rec) if (prec + rec) else 0.0
    return {'micro@P': prec, 'micro@R': rec, 'micro@F1': f1}


# ----------------------------- model -------------------------------------------
def init_params(key):
    ks = jax.random.split(key, 12)

    def n(k, shape, scale=0.02):
        return (scale * jax.random.normal(k, shape)).astype(jnp.float32)

    zeros = lambda shape: jnp.zeros(shape, jnp.float32)
    ones = lambda shape: jnp.ones(shape, jnp.float32)
    return {
        'word_emb': n(ks[0], (V, H)),
        'pos_emb': n(ks[1], (S, H)),
        'wq': n(ks[2], (H, H)), 'bq': zeros((1, H)),
        'wk': n(ks[3], (H, H)), 'bk': zeros((1, H)),
        'wv': n(ks[4], (H, H)), 'bv': zeros((1, H)),
        'wo': n(ks[5], (H, H)), 'bo': zeros((1, H)),
        'g1': ones((1, H)), 'c1': zeros((1, H)),
        'w1': n(ks[6], (H, FFN)), 'b1': zeros((1, FFN)),
        'w2': n(ks[7], (FFN, H)), 'b2': zeros((1, H)),
        'g2': ones((1, H)), 'c2': zeros((1, H)),
        'ff_w': n(ks[8], (H, T)), 'ff_b': zeros((1, T)),
        'crf_trans': n(ks[9], (T, T), 0.1),
        'crf_start': n(ks[10], (1, T), 0.1),
        'crf_end': n(ks[11], (1, T), 0.1),
    }


def ner_forward(params, batch):
    tokens, tags, token_mask, metadata = batch
    batch_size = tokens.shape[0]
    mask_f = token_mask.astype(jnp.float32)                            # (B, S)

    # embedding lookup (gather) stays host-side JAX (like feeding the torch encoder)
    emb = params['word_emb'][tokens] + params['pos_emb'][None, :, :]   # (B, S, H)

    # gold-tag helpers for the CRF numerator
    tags_oh = jax.nn.one_hot(tags, T, dtype=jnp.float32)               # (B, S, T)
    shifted = jnp.concatenate([mask_f[:, 1:], jnp.zeros((batch_size, 1), jnp.float32)], axis=1)
    last_ind = mask_f * (1.0 - shifted)                                # indicator of last valid pos
    last_oh = jnp.einsum('bs,bst->bt', last_ind, tags_oh)              # (B, T)

    # one fused Pallas kernel: encoder layer -> head -> CRF log-likelihood
    token_scores, loglik = fused_forward(
        emb.astype(jnp.float32), mask_f, mask_f[:, :, None], tags_oh, last_oh,
        pack_params(params))
    loss = -loglik[0, 0] / float(batch_size)

    # constrained Viterbi decode + span F1 (host glue, like the torch module)
    best_paths = viterbi_decode(np.asarray(token_scores), np.asarray(token_mask),
                                np.asarray(params['crf_trans']),
                                np.asarray(params['crf_start'])[0],
                                np.asarray(params['crf_end'])[0])
    pred_results = [extract_spans([ID_TO_TAG[t] for t in seq]) for seq, _ in best_paths]
    results = span_f1(pred_results, metadata)
    return {'loss': loss, 'results': results}


# ----------------------------- main ---------------------------------------------
if __name__ == "__main__":
    params = init_params(jax.random.PRNGKey(0))

    tokens = jax.random.randint(jax.random.PRNGKey(1), (B, S), 2, V).astype(jnp.int32)
    tokens = tokens.at[1, 6:].set(PAD_TOKEN_ID)
    token_mask = (tokens != PAD_TOKEN_ID).astype(jnp.int32)
    tags_np = np.array([[0, 1, 2, 0, 3, 0, 0, 0],
                        [3, 4, 0, 0, 1, 0, 0, 0]], dtype=np.int32)
    tags = jnp.asarray(tags_np)

    metadata = []
    tm_np = np.asarray(token_mask)
    for b in range(B):
        L = int(tm_np[b].sum())
        metadata.append(extract_spans([ID_TO_TAG[int(t)] for t in tags_np[b, :L]]))

    out = ner_forward(params, (tokens, tags, token_mask, metadata))
    jax.block_until_ready(out['loss'])
    print("KERNEL_OK")
</pallas_src>

<mosaic_0001>
module attributes {stable_mosaic.version = 11 : i64} {
  func.func @_fused_ner_kernel(%arg0: memref<2x8x32xf32, #tpu.memory_space<vmem>>, %arg1: memref<2x8xf32, #tpu.memory_space<vmem>>, %arg2: memref<2x8x1xf32, #tpu.memory_space<vmem>>, %arg3: memref<2x8x5xf32, #tpu.memory_space<vmem>>, %arg4: memref<2x5xf32, #tpu.memory_space<vmem>>, %arg5: memref<32x96xf32, #tpu.memory_space<vmem>>, %arg6: memref<1x96xf32, #tpu.memory_space<vmem>>, %arg7: memref<32x32xf32, #tpu.memory_space<vmem>>, %arg8: memref<32x64xf32, #tpu.memory_space<vmem>>, %arg9: memref<1x64xf32, #tpu.memory_space<vmem>>, %arg10: memref<64x32xf32, #tpu.memory_space<vmem>>, %arg11: memref<32x5xf32, #tpu.memory_space<vmem>>, %arg12: memref<6x32xf32, #tpu.memory_space<vmem>>, %arg13: memref<3x5xf32, #tpu.memory_space<vmem>>, %arg14: memref<5x5xf32, #tpu.memory_space<vmem>>, %arg15: memref<2x8x5xf32, #tpu.memory_space<vmem>>, %arg16: memref<1x1xf32, #tpu.memory_space<vmem>>) attributes {dimension_semantics = [], scalar_prefetch = 0 : i64, scratch_operands = 0 : i64, tpu.core_type = #tpu.core_type<tc>} {
    %c0 = arith.constant 0 : index
    %c0_0 = arith.constant 0 : index
    %0 = vector.load %arg12[%c0, %c0_0] : memref<6x32xf32, #tpu.memory_space<vmem>>, vector<6x32xf32>
    %1 = vector.extract_strided_slice %0 {offsets = [0, 0], sizes = [1, 32], strides = [1, 1]} : vector<6x32xf32> to vector<1x32xf32>
    %2 = vector.extract_strided_slice %0 {offsets = [1, 0], sizes = [1, 32], strides = [1, 1]} : vector<6x32xf32> to vector<1x32xf32>
    %3 = vector.extract_strided_slice %0 {offsets = [2, 0], sizes = [1, 32], strides = [1, 1]} : vector<6x32xf32> to vector<1x32xf32>
    %4 = vector.extract_strided_slice %0 {offsets = [3, 0], sizes = [1, 32], strides = [1, 1]} : vector<6x32xf32> to vector<1x32xf32>
    %5 = vector.extract_strided_slice %0 {offsets = [4, 0], sizes = [1, 32], strides = [1, 1]} : vector<6x32xf32> to vector<1x32xf32>
    %6 = vector.extract_strided_slice %0 {offsets = [5, 0], sizes = [1, 32], strides = [1, 1]} : vector<6x32xf32> to vector<1x32xf32>
    %c0_1 = arith.constant 0 : index
    %c0_2 = arith.constant 0 : index
    %7 = vector.load %arg13[%c0_1, %c0_2] : memref<3x5xf32, #tpu.memory_space<vmem>>, vector<3x5xf32>
    %8 = vector.extract_strided_slice %7 {offsets = [0, 0], sizes = [1, 5], strides = [1, 1]} : vector<3x5xf32> to vector<1x5xf32>
    %9 = vector.extract_strided_slice %7 {offsets = [1, 0], sizes = [1, 5], strides = [1, 1]} : vector<3x5xf32> to vector<1x5xf32>
    %10 = vector.extract_strided_slice %7 {offsets = [2, 0], sizes = [1, 5], strides = [1, 1]} : vector<3x5xf32> to vector<1x5xf32>
    %c0_3 = arith.constant 0 : index
    %c0_4 = arith.constant 0 : index
    %11 = vector.load %arg5[%c0_3, %c0_4] : memref<32x96xf32, #tpu.memory_space<vmem>>, vector<32x96xf32>
    %c0_5 = arith.constant 0 : index
    %c0_6 = arith.constant 0 : index
    %12 = vector.load %arg6[%c0_5, %c0_6] : memref<1x96xf32, #tpu.memory_space<vmem>>, vector<1x96xf32>
    %c0_7 = arith.constant 0 : index
    %c0_8 = arith.constant 0 : index
    %13 = vector.load %arg7[%c0_7, %c0_8] : memref<32x32xf32, #tpu.memory_space<vmem>>, vector<32x32xf32>
    %c0_9 = arith.constant 0 : index
    %c0_10 = arith.constant 0 : index
    %14 = vector.load %arg8[%c0_9, %c0_10] : memref<32x64xf32, #tpu.memory_space<vmem>>, vector<32x64xf32>
    %c0_11 = arith.constant 0 : index
    %c0_12 = arith.constant 0 : index
    %15 = vector.load %arg9[%c0_11, %c0_12] : memref<1x64xf32, #tpu.memory_space<vmem>>, vector<1x64xf32>
    %c0_13 = arith.constant 0 : index
    %c0_14 = arith.constant 0 : index
    %16 = vector.load %arg10[%c0_13, %c0_14] : memref<64x32xf32, #tpu.memory_space<vmem>>, vector<64x32xf32>
    %c0_15 = arith.constant 0 : index
    %c0_16 = arith.constant 0 : index
    %17 = vector.load %arg11[%c0_15, %c0_16] : memref<32x5xf32, #tpu.memory_space<vmem>>, vector<32x5xf32>
    %c0_17 = arith.constant 0 : index
    %c0_18 = arith.constant 0 : index
    %18 = vector.load %arg14[%c0_17, %c0_18] : memref<5x5xf32, #tpu.memory_space<vmem>>, vector<5x5xf32>
    %c0_19 = arith.constant 0 : index
    %c0_20 = arith.constant 0 : index
    %19 = vector.load %arg1[%c0_19, %c0_20] : memref<2x8xf32, #tpu.memory_space<vmem>>, vector<2x8xf32>
    %cst = arith.constant 1.000000e+00 : f32
    %20 = vector.broadcast %cst : f32 to vector<2x8xf32>
    %21 = arith.subf %19, %20 : vector<2x8xf32>
    %cst_21 = arith.constant 1.000000e+09 : f32
    %22 = vector.broadcast %cst_21 : f32 to vector<2x8xf32>
    %23 = arith.mulf %21, %22 : vector<2x8xf32>
    %24 = vector.shape_cast %18 : vector<5x5xf32> to vector<1x5x5xf32>
    %cst_22 = arith.constant dense<0xFF800000> : vector<1xf32>
    %25 = vector.multi_reduction <maximumf>, %24, %cst_22 [1, 2] : vector<1x5x5xf32> to vector<1xf32>
    %26 = vector.shape_cast %25 : vector<1xf32> to vector<1x1x1xf32>
    %27 = vector.extract %26[0, 0, 0] : f32 from vector<1x1x1xf32>
    %28 = vector.broadcast %27 : f32 to vector<1x1xf32>
    %29 = vector.broadcast %28 : vector<1x1xf32> to vector<5x5xf32>
    %30 = arith.subf %18, %29 : vector<5x5xf32>
    %31 = math.exp %30 : vector<5x5xf32>
    %cst_23 = arith.constant 0.000000e+00 : f32
    %32 = vector.broadcast %cst_23 : f32 to vector<1x1xf32>
    %c0_24 = arith.constant 0 : index
    %c0_25 = arith.constant 0 : index
    %c0_26 = arith.constant 0 : index
    %33 = vector.load %arg0[%c0_24, %c0_25, %c0_26] : memref<2x8x32xf32, #tpu.memory_space<vmem>>, vector<1x8x32xf32>
    %34 = vector.shape_cast %33 : vector<1x8x32xf32> to vector<8x32xf32>
    %cst_27 = arith.constant dense<0.000000e+00> : vector<8x96xf32>
    %35 = tpu.matmul %34, %11, %cst_27 {dimension_numbers = #tpu.dot_dimension_numbers<[1], [0], [0], [1], [0, 0, 1, 1], [], []>} : vector<8x32xf32>, vector<32x96xf32>, vector<8x96xf32> -> vector<8x96xf32>
    %36 = vector.broadcast %12 : vector<1x96xf32> to vector<8x96xf32>
    %37 = arith.addf %35, %36 : vector<8x96xf32>
    %38 = vector.extract_strided_slice %37 {offsets = [0, 0], sizes = [8, 32], strides = [1, 1]} : vector<8x96xf32> to vector<8x32xf32>
    %39 = vector.extract_strided_slice %37 {offsets = [0, 32], sizes = [8, 32], strides = [1, 1]} : vector<8x96xf32> to vector<8x32xf32>
    %40 = vector.extract_strided_slice %37 {offsets = [0, 64], sizes = [8, 32], strides = [1, 1]} : vector<8x96xf32> to vector<8x32xf32>
    %cst_28 = arith.constant dense<0.000000e+00> : vector<8x8xf32>
    %41 = tpu.matmul %38, %39, %cst_28 {dimension_numbers = #tpu.dot_dimension_numbers<[1], [1], [0], [0], [0, 0, 1, 0], [], []>} : vector<8x32xf32>, vector<8x32xf32>, vector<8x8xf32> -> vector<8x8xf32>
    %42 = vector.extract_strided_slice %23 {offsets = [0, 0], sizes = [1, 8], strides = [1, 1]} : vector<2x8xf32> to vector<1x8xf32>
    %43 = vector.broadcast %42 : vector<1x8xf32> to vector<8x8xf32>
    %44 = arith.addf %41, %43 : vector<8x8xf32>
    %cst_29 = arith.constant dense<0xFF800000> : vector<8xf32>
    %45 = vector.multi_reduction <maximumf>, %44, %cst_29 [1] : vector<8x8xf32> to vector<8xf32>
    %46 = vector.shape_cast %45 : vector<8xf32> to vector<8x1xf32>
    %47 = vector.broadcast %46 : vector<8x1xf32> to vector<8x8xf32>
    %48 = arith.subf %44, %47 : vector<8x8xf32>
    %49 = math.exp %48 : vector<8x8xf32>
    %cst_30 = arith.constant dense<0.000000e+00> : vector<8xf32>
    %50 = vector.multi_reduction <add>, %49, %cst_30 [1] : vector<8x8xf32> to vector<8xf32>
    %51 = vector.shape_cast %50 : vector<8xf32> to vector<8x1xf32>
    %52 = vector.broadcast %51 : vector<8x1xf32> to vector<8x8xf32>
    %53 = arith.divf %49, %52 : vector<8x8xf32>
    %cst_31 = arith.constant dense<0.000000e+00> : vector<8x32xf32>
    %54 = tpu.matmul %53, %40, %cst_31 {dimension_numbers = #tpu.dot_dimension_numbers<[1], [0], [0], [1], [0, 0, 1, 1], [], []>} : vector<8x8xf32>, vector<8x32xf32>, vector<8x32xf32> -> vector<8x32xf32>
    %cst_32 = arith.constant dense<0.000000e+00> : vector<8x32xf32>
    %55 = tpu.matmul %54, %13, %cst_32 {dimension_numbers = #tpu.dot_dimension_numbers<[1], [0], [0], [1], [0, 0, 1, 1], [], []>} : vector<8x32xf32>, vector<32x32xf32>, vector<8x32xf32> -> vector<8x32xf32>
    %56 = vector.broadcast %1 : vector<1x32xf32> to vector<8x32xf32>
    %57 = arith.addf %55, %56 : vector<8x32xf32>
    %58 = arith.addf %34, %57 : vector<8x32xf32>
    %cst_33 = arith.constant dense<0.000000e+00> : vector<8xf32>
    %59 = vector.multi_reduction <add>, %58, %cst_33 [1] : vector<8x32xf32> to vector<8xf32>
    %60 = vector.shape_cast %59 : vector<8xf32> to vector<8x1xf32>
    %cst_34 = arith.constant 3.200000e+01 : f32
    %61 = vector.broadcast %cst_34 : f32 to vector<8x1xf32>
    %62 = arith.divf %60, %61 : vector<8x1xf32>
    %63 = vector.broadcast %62 : vector<8x1xf32> to vector<8x32xf32>
    %64 = arith.subf %58, %63 : vector<8x32xf32>
    %65 = arith.mulf %64, %64 : vector<8x32xf32>
    %cst_35 = arith.constant dense<0.000000e+00> : vector<8xf32>
    %66 = vector.multi_reduction <add>, %65, %cst_35 [1] : vector<8x32xf32> to vector<8xf32>
    %67 = vector.shape_cast %66 : vector<8xf32> to vector<8x1xf32>
    %cst_36 = arith.constant 3.200000e+01 : f32
    %68 = vector.broadcast %cst_36 : f32 to vector<8x1xf32>
    %69 = arith.divf %67, %68 : vector<8x1xf32>
    %70 = vector.broadcast %62 : vector<8x1xf32> to vector<8x32xf32>
    %71 = arith.subf %58, %70 : vector<8x32xf32>
    %cst_37 = arith.constant 9.99999974E-6 : f32
    %72 = vector.broadcast %cst_37 : f32 to vector<8x1xf32>
    %73 = arith.addf %69, %72 : vector<8x1xf32>
    %74 = math.rsqrt %73 : vector<8x1xf32>
    %75 = vector.broadcast %74 : vector<8x1xf32> to vector<8x32xf32>
    %76 = arith.mulf %71, %75 : vector<8x32xf32>
    %77 = vector.broadcast %2 : vector<1x32xf32> to vector<8x32xf32>
    %78 = arith.mulf %76, %77 : vector<8x32xf32>
    %79 = vector.broadcast %3 : vector<1x32xf32> to vector<8x32xf32>
    %80 = arith.addf %78, %79 : vector<8x32xf32>
    %cst_38 = arith.constant dense<0.000000e+00> : vector<8x64xf32>
    %81 = tpu.matmul %80, %14, %cst_38 {dimension_numbers = #tpu.dot_dimension_numbers<[1], [0], [0], [1], [0, 0, 1, 1], [], []>} : vector<8x32xf32>, vector<32x64xf32>, vector<8x64xf32> -> vector<8x64xf32>
    %82 = vector.broadcast %15 : vector<1x64xf32> to vector<8x64xf32>
    %83 = arith.addf %81, %82 : vector<8x64xf32>
    %84 = arith.mulf %83, %83 : vector<8x64xf32>
    %85 = arith.mulf %83, %84 : vector<8x64xf32>
    %cst_39 = arith.constant 4.471500e-02 : f32
    %86 = vector.broadcast %cst_39 : f32 to vector<8x64xf32>
    %87 = arith.mulf %86, %85 : vector<8x64xf32>
    %88 = arith.addf %83, %87 : vector<8x64xf32>
    %cst_40 = arith.constant 0.797884583 : f32
    %89 = vector.broadcast %cst_40 : f32 to vector<8x64xf32>
    %90 = arith.mulf %89, %88 : vector<8x64xf32>
    %91 = math.tanh %90 : vector<8x64xf32>
    %cst_41 = arith.constant 1.000000e+00 : f32
    %92 = vector.broadcast %cst_41 : f32 to vector<8x64xf32>
    %93 = arith.addf %92, %91 : vector<8x64xf32>
    %cst_42 = arith.constant 5.000000e-01 : f32
    %94 = vector.broadcast %cst_42 : f32 to vector<8x64xf32>
    %95 = arith.mulf %94, %93 : vector<8x64xf32>
    %96 = arith.mulf %83, %95 : vector<8x64xf32>
    %cst_43 = arith.constant dense<0.000000e+00> : vector<8x32xf32>
    %97 = tpu.matmul %96, %16, %cst_43 {dimension_numbers = #tpu.dot_dimension_numbers<[1], [0], [0], [1], [0, 0, 1, 1], [], []>} : vector<8x64xf32>, vector<64x32xf32>, vector<8x32xf32> -> vector<8x32xf32>
    %98 = vector.broadcast %4 : vector<1x32xf32> to vector<8x32xf32>
    %99 = arith.addf %97, %98 : vector<8x32xf32>
    %100 = arith.addf %80, %99 : vector<8x32xf32>
    %cst_44 = arith.constant dense<0.000000e+00> : vector<8xf32>
    %101 = vector.multi_reduction <add>, %100, %cst_44 [1] : vector<8x32xf32> to vector<8xf32>
    %102 = vector.shape_cast %101 : vector<8xf32> to vector<8x1xf32>
    %cst_45 = arith.constant 3.200000e+01 : f32
    %103 = vector.broadcast %cst_45 : f32 to vector<8x1xf32>
    %104 = arith.divf %102, %103 : vector<8x1xf32>
    %105 = vector.broadcast %104 : vector<8x1xf32> to vector<8x32xf32>
    %106 = arith.subf %100, %105 : vector<8x32xf32>
    %107 = arith.mulf %106, %106 : vector<8x32xf32>
    %cst_46 = arith.constant dense<0.000000e+00> : vector<8xf32>
    %108 = vector.multi_reduction <add>, %107, %cst_46 [1] : vector<8x32xf32> to vector<8xf32>
    %109 = vector.shape_cast %108 : vector<8xf32> to vector<8x1xf32>
    %cst_47 = arith.constant 3.200000e+01 : f32
    %110 = vector.broadcast %cst_47 : f32 to vector<8x1xf32>
    %111 = arith.divf %109, %110 : vector<8x1xf32>
    %112 = vector.broadcast %104 : vector<8x1xf32> to vector<8x32xf32>
    %113 = arith.subf %100, %112 : vector<8x32xf32>
    %cst_48 = arith.constant 9.99999974E-6 : f32
    %114 = vector.broadcast %cst_48 : f32 to vector<8x1xf32>
    %115 = arith.addf %111, %114 : vector<8x1xf32>
    %116 = math.rsqrt %115 : vector<8x1xf32>
    %117 = vector.broadcast %116 : vector<8x1xf32> to vector<8x32xf32>
    %118 = arith.mulf %113, %117 : vector<8x32xf32>
    %119 = vector.broadcast %5 : vector<1x32xf32> to vector<8x32xf32>
    %120 = arith.mulf %118, %119 : vector<8x32xf32>
    %121 = vector.broadcast %6 : vector<1x32xf32> to vector<8x32xf32>
    %122 = arith.addf %120, %121 : vector<8x32xf32>
    %cst_49 = arith.constant 0.000000e+00 : f32
    %123 = vector.broadcast %cst_49 : f32 to vector<8x32xf32>
    %124 = arith.cmpf oge, %122, %123 : vector<8x32xf32>
    %cst_50 = arith.constant 0.00999999977 : f32
    %125 = vector.broadcast %cst_50 : f32 to vector<8x32xf32>
    %126 = arith.mulf %125, %122 : vector<8x32xf32>
    %127 = arith.select %124, %122, %126 : vector<8x32xi1>, vector<8x32xf32>
    %cst_51 = arith.constant dense<0.000000e+00> : vector<8x5xf32>
    %128 = tpu.matmul %127, %17, %cst_51 {dimension_numbers = #tpu.dot_dimension_numbers<[1], [0], [0], [1], [0, 0, 1, 1], [], []>} : vector<8x32xf32>, vector<32x5xf32>, vector<8x5xf32> -> vector<8x5xf32>
    %129 = vector.broadcast %8 : vector<1x5xf32> to vector<8x5xf32>
    %130 = arith.addf %128, %129 : vector<8x5xf32>
    %c0_52 = arith.constant 0 : index
    %c0_53 = arith.constant 0 : index
    %c0_54 = arith.constant 0 : index
    %131 = vector.load %arg15[%c0_52, %c0_53, %c0_54] : memref<2x8x5xf32, #tpu.memory_space<vmem>>, vector<1x8x5xf32>
    %132 = vector.shape_cast %131 : vector<1x8x5xf32> to vector<8x5xf32>
    %133 = vector.shape_cast %130 : vector<8x5xf32> to vector<1x8x5xf32>
    tpu.vector_store %arg15[%c0_52, %c0_53, %c0_54], %133 {strides = array<i32>} : memref<2x8x5xf32, #tpu.memory_space<vmem>>, vector<1x8x5xf32>,
    %c0_55 = arith.constant 0 : index
    %c0_56 = arith.constant 0 : index
    %c0_57 = arith.constant 0 : index
    %134 = vector.load %arg3[%c0_55, %c0_56, %c0_57] : memref<2x8x5xf32, #tpu.memory_space<vmem>>, vector<1x8x5xf32>
    %135 = vector.shape_cast %134 : vector<1x8x5xf32> to vector<8x5xf32>
    %c0_58 = arith.constant 0 : index
    %c0_59 = arith.constant 0 : index
    %c0_60 = arith.constant 0 : index
    %136 = vector.load %arg2[%c0_58, %c0_59, %c0_60] : memref<2x8x1xf32, #tpu.memory_space<vmem>>, vector<1x8x1xf32>
    %137 = vector.shape_cast %136 : vector<1x8x1xf32> to vector<8x1xf32>
    %138 = arith.mulf %130, %135 : vector<8x5xf32>
    %139 = vector.broadcast %137 : vector<8x1xf32> to vector<8x5xf32>
    %140 = arith.mulf %138, %139 : vector<8x5xf32>
    %141 = vector.shape_cast %140 : vector<8x5xf32> to vector<1x8x5xf32>
    %cst_61 = arith.constant dense<0.000000e+00> : vector<1xf32>
    %142 = vector.multi_reduction <add>, %141, %cst_61 [1, 2] : vector<1x8x5xf32> to vector<1xf32>
    %143 = vector.shape_cast %142 : vector<1xf32> to vector<1x1x1xf32>
    %144 = vector.extract %143[0, 0, 0] : f32 from vector<1x1x1xf32>
    %145 = vector.broadcast %144 : f32 to vector<1x1xf32>
    %146 = vector.extract_strided_slice %135 {offsets = [0, 0], sizes = [7, 5], strides = [1, 1]} : vector<8x5xf32> to vector<7x5xf32>
    %cst_62 = arith.constant dense<0.000000e+00> : vector<7x5xf32>
    %147 = tpu.matmul %146, %18, %cst_62 {dimension_numbers = #tpu.dot_dimension_numbers<[1], [0], [0], [1], [0, 0, 1, 1], [], []>} : vector<7x5xf32>, vector<5x5xf32>, vector<7x5xf32> -> vector<7x5xf32>
    %148 = vector.extract_strided_slice %135 {offsets = [1, 0], sizes = [7, 5], strides = [1, 1]} : vector<8x5xf32> to vector<7x5xf32>
    %149 = arith.mulf %147, %148 : vector<7x5xf32>
    %150 = vector.extract_strided_slice %137 {offsets = [1, 0], sizes = [7, 1], strides = [1, 1]} : vector<8x1xf32> to vector<7x1xf32>
    %151 = vector.broadcast %150 : vector<7x1xf32> to vector<7x5xf32>
    %152 = arith.mulf %149, %151 : vector<7x5xf32>
    %153 = vector.shape_cast %152 : vector<7x5xf32> to vector<1x7x5xf32>
    %cst_63 = arith.constant dense<0.000000e+00> : vector<1xf32>
    %154 = vector.multi_reduction <add>, %153, %cst_63 [1, 2] : vector<1x7x5xf32> to vector<1xf32>
    %155 = vector.shape_cast %154 : vector<1xf32> to vector<1x1x1xf32>
    %156 = vector.extract %155[0, 0, 0] : f32 from vector<1x1x1xf32>
    %157 = vector.broadcast %156 : f32 to vector<1x1xf32>
    %158 = vector.extract_strided_slice %135 {offsets = [0, 0], sizes = [1, 5], strides = [1, 1]} : vector<8x5xf32> to vector<1x5xf32>
    %159 = arith.mulf %9, %158 : vector<1x5xf32>
    %160 = vector.shape_cast %159 : vector<1x5xf32> to vector<1x1x5xf32>
    %cst_64 = arith.constant dense<0.000000e+00> : vector<1xf32>
    %161 = vector.multi_reduction <add>, %160, %cst_64 [1, 2] : vector<1x1x5xf32> to vector<1xf32>
    %162 = vector.shape_cast %161 : vector<1xf32> to vector<1x1x1xf32>
    %163 = vector.extract %162[0, 0, 0] : f32 from vector<1x1x1xf32>
    %164 = vector.broadcast %163 : f32 to vector<1x1xf32>
    %165 = arith.addf %32, %145 : vector<1x1xf32>
    %166 = arith.addf %165, %157 : vector<1x1xf32>
    %167 = arith.addf %166, %164 : vector<1x1xf32>
    %c1 = arith.constant 1 : index
    %c0_65 = arith.constant 0 : index
    %c0_66 = arith.constant 0 : index
    %168 = vector.load %arg0[%c1, %c0_65, %c0_66] : memref<2x8x32xf32, #tpu.memory_space<vmem>>, vector<1x8x32xf32>
    %169 = vector.shape_cast %168 : vector<1x8x32xf32> to vector<8x32xf32>
    %cst_67 = arith.constant dense<0.000000e+00> : vector<8x96xf32>
    %170 = tpu.matmul %169, %11, %cst_67 {dimension_numbers = #tpu.dot_dimension_numbers<[1], [0], [0], [1], [0, 0, 1, 1], [], []>} : vector<8x32xf32>, vector<32x96xf32>, vector<8x96xf32> -> vector<8x96xf32>
    %171 = vector.broadcast %12 : vector<1x96xf32> to vector<8x96xf32>
    %172 = arith.addf %170, %171 : vector<8x96xf32>
    %173 = vector.extract_strided_slice %172 {offsets = [0, 0], sizes = [8, 32], strides = [1, 1]} : vector<8x96xf32> to vector<8x32xf32>
    %174 = vector.extract_strided_slice %172 {offsets = [0, 32], sizes = [8, 32], strides = [1, 1]} : vector<8x96xf32> to vector<8x32xf32>
    %175 = vector.extract_strided_slice %172 {offsets = [0, 64], sizes = [8, 32], strides = [1, 1]} : vector<8x96xf32> to vector<8x32xf32>
    %cst_68 = arith.constant dense<0.000000e+00> : vector<8x8xf32>
    %176 = tpu.matmul %173, %174, %cst_68 {dimension_numbers = #tpu.dot_dimension_numbers<[1], [1], [0], [0], [0, 0, 1, 0], [], []>} : vector<8x32xf32>, vector<8x32xf32>, vector<8x8xf32> -> vector<8x8xf32>
    %177 = vector.extract_strided_slice %23 {offsets = [1, 0], sizes = [1, 8], strides = [1, 1]} : vector<2x8xf32> to vector<1x8xf32>
    %178 = vector.broadcast %177 : vector<1x8xf32> to vector<8x8xf32>
    %179 = arith.addf %176, %178 : vector<8x8xf32>
    %cst_69 = arith.constant dense<0xFF800000> : vector<8xf32>
    %180 = vector.multi_reduction <maximumf>, %179, %cst_69 [1] : vector<8x8xf32> to vector<8xf32>
    %181 = vector.shape_cast %180 : vector<8xf32> to vector<8x1xf32>
    %182 = vector.broadcast %181 : vector<8x1xf32> to vector<8x8xf32>
    %183 = arith.subf %179, %182 : vector<8x8xf32>
    %184 = math.exp %183 : vector<8x8xf32>
    %cst_70 = arith.constant dense<0.000000e+00> : vector<8xf32>
    %185 = vector.multi_reduction <add>, %184, %cst_70 [1] : vector<8x8xf32> to vector<8xf32>
    %186 = vector.shape_cast %185 : vector<8xf32> to vector<8x1xf32>
    %187 = vector.broadcast %186 : vector<8x1xf32> to vector<8x8xf32>
    %188 = arith.divf %184, %187 : vector<8x8xf32>
    %cst_71 = arith.constant dense<0.000000e+00> : vector<8x32xf32>
    %189 = tpu.matmul %188, %175, %cst_71 {dimension_numbers = #tpu.dot_dimension_numbers<[1], [0], [0], [1], [0, 0, 1, 1], [], []>} : vector<8x8xf32>, vector<8x32xf32>, vector<8x32xf32> -> vector<8x32xf32>
    %cst_72 = arith.constant dense<0.000000e+00> : vector<8x32xf32>
    %190 = tpu.matmul %189, %13, %cst_72 {dimension_numbers = #tpu.dot_dimension_numbers<[1], [0], [0], [1], [0, 0, 1, 1], [], []>} : vector<8x32xf32>, vector<32x32xf32>, vector<8x32xf32> -> vector<8x32xf32>
    %191 = vector.broadcast %1 : vector<1x32xf32> to vector<8x32xf32>
    %192 = arith.addf %190, %191 : vector<8x32xf32>
    %193 = arith.addf %169, %192 : vector<8x32xf32>
    %cst_73 = arith.constant dense<0.000000e+00> : vector<8xf32>
    %194 = vector.multi_reduction <add>, %193, %cst_73 [1] : vector<8x32xf32> to vector<8xf32>
    %195 = vector.shape_cast %194 : vector<8xf32> to vector<8x1xf32>
    %cst_74 = arith.constant 3.200000e+01 : f32
    %196 = vector.broadcast %cst_74 : f32 to vector<8x1xf32>
    %197 = arith.divf %195, %196 : vector<8x1xf32>
    %198 = vector.broadcast %197 : vector<8x1xf32> to vector<8x32xf32>
    %199 = arith.subf %193, %198 : vector<8x32xf32>
    %200 = arith.mulf %199, %199 : vector<8x32xf32>
    %cst_75 = arith.constant dense<0.000000e+00> : vector<8xf32>
    %201 = vector.multi_reduction <add>, %200, %cst_75 [1] : vector<8x32xf32> to vector<8xf32>
    %202 = vector.shape_cast %201 : vector<8xf32> to vector<8x1xf32>
    %cst_76 = arith.constant 3.200000e+01 : f32
    %203 = vector.broadcast %cst_76 : f32 to vector<8x1xf32>
    %204 = arith.divf %202, %203 : vector<8x1xf32>
    %205 = vector.broadcast %197 : vector<8x1xf32> to vector<8x32xf32>
    %206 = arith.subf %193, %205 : vector<8x32xf32>
    %cst_77 = arith.constant 9.99999974E-6 : f32
    %207 = vector.broadcast %cst_77 : f32 to vector<8x1xf32>
    %208 = arith.addf %204, %207 : vector<8x1xf32>
    %209 = math.rsqrt %208 : vector<8x1xf32>
    %210 = vector.broadcast %209 : vector<8x1xf32> to vector<8x32xf32>
    %211 = arith.mulf %206, %210 : vector<8x32xf32>
    %212 = vector.broadcast %2 : vector<1x32xf32> to vector<8x32xf32>
    %213 = arith.mulf %211, %212 : vector<8x32xf32>
    %214 = vector.broadcast %3 : vector<1x32xf32> to vector<8x32xf32>
    %215 = arith.addf %213, %214 : vector<8x32xf32>
    %cst_78 = arith.constant dense<0.000000e+00> : vector<8x64xf32>
    %216 = tpu.matmul %215, %14, %cst_78 {dimension_numbers = #tpu.dot_dimension_numbers<[1], [0], [0], [1], [0, 0, 1, 1], [], []>} : vector<8x32xf32>, vector<32x64xf32>, vector<8x64xf32> -> vector<8x64xf32>
    %217 = vector.broadcast %15 : vector<1x64xf32> to vector<8x64xf32>
    %218 = arith.addf %216, %217 : vector<8x64xf32>
    %219 = arith.mulf %218, %218 : vector<8x64xf32>
    %220 = arith.mulf %218, %219 : vector<8x64xf32>
    %cst_79 = arith.constant 4.471500e-02 : f32
    %221 = vector.broadcast %cst_79 : f32 to vector<8x64xf32>
    %222 = arith.mulf %221, %220 : vector<8x64xf32>
    %223 = arith.addf %218, %222 : vector<8x64xf32>
    %cst_80 = arith.constant 0.797884583 : f32
    %224 = vector.broadcast %cst_80 : f32 to vector<8x64xf32>
    %225 = arith.mulf %224, %223 : vector<8x64xf32>
    %226 = math.tanh %225 : vector<8x64xf32>
    %cst_81 = arith.constant 1.000000e+00 : f32
    %227 = vector.broadcast %cst_81 : f32 to vector<8x64xf32>
    %228 = arith.addf %227, %226 : vector<8x64xf32>
    %cst_82 = arith.constant 5.000000e-01 : f32
    %229 = vector.broadcast %cst_82 : f32 to vector<8x64xf32>
    %230 = arith.mulf %229, %228 : vector<8x64xf32>
    %231 = arith.mulf %218, %230 : vector<8x64xf32>
    %cst_83 = arith.constant dense<0.000000e+00> : vector<8x32xf32>
    %232 = tpu.matmul %231, %16, %cst_83 {dimension_numbers = #tpu.dot_dimension_numbers<[1], [0], [0], [1], [0, 0, 1, 1], [], []>} : vector<8x64xf32>, vector<64x32xf32>, vector<8x32xf32> -> vector<8x32xf32>
    %233 = vector.broadcast %4 : vector<1x32xf32> to vector<8x32xf32>
    %234 = arith.addf %232, %233 : vector<8x32xf32>
    %235 = arith.addf %215, %234 : vector<8x32xf32>
    %cst_84 = arith.constant dense<0.000000e+00> : vector<8xf32>
    %236 = vector.multi_reduction <add>, %235, %cst_84 [1] : vector<8x32xf32> to vector<8xf32>
    %237 = vector.shape_cast %236 : vector<8xf32> to vector<8x1xf32>
    %cst_85 = arith.constant 3.200000e+01 : f32
    %238 = vector.broadcast %cst_85 : f32 to vector<8x1xf32>
    %239 = arith.divf %237, %238 : vector<8x1xf32>
    %240 = vector.broadcast %239 : vector<8x1xf32> to vector<8x32xf32>
    %241 = arith.subf %235, %240 : vector<8x32xf32>
    %242 = arith.mulf %241, %241 : vector<8x32xf32>
    %cst_86 = arith.constant dense<0.000000e+00> : vector<8xf32>
    %243 = vector.multi_reduction <add>, %242, %cst_86 [1] : vector<8x32xf32> to vector<8xf32>
    %244 = vector.shape_cast %243 : vector<8xf32> to vector<8x1xf32>
    %cst_87 = arith.constant 3.200000e+01 : f32
    %245 = vector.broadcast %cst_87 : f32 to vector<8x1xf32>
    %246 = arith.divf %244, %245 : vector<8x1xf32>
    %247 = vector.broadcast %239 : vector<8x1xf32> to vector<8x32xf32>
    %248 = arith.subf %235, %247 : vector<8x32xf32>
    %cst_88 = arith.constant 9.99999974E-6 : f32
    %249 = vector.broadcast %cst_88 : f32 to vector<8x1xf32>
    %250 = arith.addf %246, %249 : vector<8x1xf32>
    %251 = math.rsqrt %250 : vector<8x1xf32>
    %252 = vector.broadcast %251 : vector<8x1xf32> to vector<8x32xf32>
    %253 = arith.mulf %248, %252 : vector<8x32xf32>
    %254 = vector.broadcast %5 : vector<1x32xf32> to vector<8x32xf32>
    %255 = arith.mulf %253, %254 : vector<8x32xf32>
    %256 = vector.broadcast %6 : vector<1x32xf32> to vector<8x32xf32>
    %257 = arith.addf %255, %256 : vector<8x32xf32>
    %cst_89 = arith.constant 0.000000e+00 : f32
    %258 = vector.broadcast %cst_89 : f32 to vector<8x32xf32>
    %259 = arith.cmpf oge, %257, %258 : vector<8x32xf32>
    %cst_90 = arith.constant 0.00999999977 : f32
    %260 = vector.broadcast %cst_90 : f32 to vector<8x32xf32>
    %261 = arith.mulf %260, %257 : vector<8x32xf32>
    %262 = arith.select %259, %257, %261 : vector<8x32xi1>, vector<8x32xf32>
    %cst_91 = arith.constant dense<0.000000e+00> : vector<8x5xf32>
    %263 = tpu.matmul %262, %17, %cst_91 {dimension_numbers = #tpu.dot_dimension_numbers<[1], [0], [0], [1], [0, 0, 1, 1], [], []>} : vector<8x32xf32>, vector<32x5xf32>, vector<8x5xf32> -> vector<8x5xf32>
    %264 = vector.broadcast %8 : vector<1x5xf32> to vector<8x5xf32>
    %265 = arith.addf %263, %264 : vector<8x5xf32>
    %c1_92 = arith.constant 1 : index
    %c0_93 = arith.constant 0 : index
    %c0_94 = arith.constant 0 : index
    %266 = vector.load %arg15[%c1_92, %c0_93, %c0_94] : memref<2x8x5xf32, #tpu.memory_space<vmem>>, vector<1x8x5xf32>
    %267 = vector.shape_cast %266 : vector<1x8x5xf32> to vector<8x5xf32>
    %268 = vector.shape_cast %265 : vector<8x5xf32> to vector<1x8x5xf32>
    tpu.vector_store %arg15[%c1_92, %c0_93, %c0_94], %268 {strides = array<i32>} : memref<2x8x5xf32, #tpu.memory_space<vmem>>, vector<1x8x5xf32>,
    %c1_95 = arith.constant 1 : index
    %c0_96 = arith.constant 0 : index
    %c0_97 = arith.constant 0 : index
    %269 = vector.load %arg3[%c1_95, %c0_96, %c0_97] : memref<2x8x5xf32, #tpu.memory_space<vmem>>, vector<1x8x5xf32>
    %270 = vector.shape_cast %269 : vector<1x8x5xf32> to vector<8x5xf32>
    %c1_98 = arith.constant 1 : index
    %c0_99 = arith.constant 0 : index
    %c0_100 = arith.constant 0 : index
    %271 = vector.load %arg2[%c1_98, %c0_99, %c0_100] : memref<2x8x1xf32, #tpu.memory_space<vmem>>, vector<1x8x1xf32>
    %272 = vector.shape_cast %271 : vector<1x8x1xf32> to vector<8x1xf32>
    %273 = arith.mulf %265, %270 : vector<8x5xf32>
    %274 = vector.broadcast %272 : vector<8x1xf32> to vector<8x5xf32>
    %275 = arith.mulf %273, %274 : vector<8x5xf32>
    %276 = vector.shape_cast %275 : vector<8x5xf32> to vector<1x8x5xf32>
    %cst_101 = arith.constant dense<0.000000e+00> : vector<1xf32>
    %277 = vector.multi_reduction <add>, %276, %cst_101 [1, 2] : vector<1x8x5xf32> to vector<1xf32>
    %278 = vector.shape_cast %277 : vector<1xf32> to vector<1x1x1xf32>
    %279 = vector.extract %278[0, 0, 0] : f32 from vector<1x1x1xf32>
    %280 = vector.broadcast %279 : f32 to vector<1x1xf32>
    %281 = vector.extract_strided_slice %270 {offsets = [0, 0], sizes = [7, 5], strides = [1, 1]} : vector<8x5xf32> to vector<7x5xf32>
    %cst_102 = arith.constant dense<0.000000e+00> : vector<7x5xf32>
    %282 = tpu.matmul %281, %18, %cst_102 {dimension_numbers = #tpu.dot_dimension_numbers<[1], [0], [0], [1], [0, 0, 1, 1], [], []>} : vector<7x5xf32>, vector<5x5xf32>, vector<7x5xf32> -> vector<7x5xf32>
    %283 = vector.extract_strided_slice %270 {offsets = [1, 0], sizes = [7, 5], strides = [1, 1]} : vector<8x5xf32> to vector<7x5xf32>
    %284 = arith.mulf %282, %283 : vector<7x5xf32>
    %285 = vector.extract_strided_slice %272 {offsets = [1, 0], sizes = [7, 1], strides = [1, 1]} : vector<8x1xf32> to vector<7x1xf32>
    %286 = vector.broadcast %285 : vector<7x1xf32> to vector<7x5xf32>
    %287 = arith.mulf %284, %286 : vector<7x5xf32>
    %288 = vector.shape_cast %287 : vector<7x5xf32> to vector<1x7x5xf32>
    %cst_103 = arith.constant dense<0.000000e+00> : vector<1xf32>
    %289 = vector.multi_reduction <add>, %288, %cst_103 [1, 2] : vector<1x7x5xf32> to vector<1xf32>
    %290 = vector.shape_cast %289 : vector<1xf32> to vector<1x1x1xf32>
    %291 = vector.extract %290[0, 0, 0] : f32 from vector<1x1x1xf32>
    %292 = vector.broadcast %291 : f32 to vector<1x1xf32>
    %293 = vector.extract_strided_slice %270 {offsets = [0, 0], sizes = [1, 5], strides = [1, 1]} : vector<8x5xf32> to vector<1x5xf32>
    %294 = arith.mulf %9, %293 : vector<1x5xf32>
    %295 = vector.shape_cast %294 : vector<1x5xf32> to vector<1x1x5xf32>
    %cst_104 = arith.constant dense<0.000000e+00> : vector<1xf32>
    %296 = vector.multi_reduction <add>, %295, %cst_104 [1, 2] : vector<1x1x5xf32> to vector<1xf32>
    %297 = vector.shape_cast %296 : vector<1xf32> to vector<1x1x1xf32>
    %298 = vector.extract %297[0, 0, 0] : f32 from vector<1x1x1xf32>
    %299 = vector.broadcast %298 : f32 to vector<1x1xf32>
    %300 = arith.addf %167, %280 : vector<1x1xf32>
    %301 = arith.addf %300, %292 : vector<1x1xf32>
    %302 = arith.addf %301, %299 : vector<1x1xf32>
    %c0_105 = arith.constant 0 : index
    %c0_106 = arith.constant 0 : index
    %303 = vector.load %arg4[%c0_105, %c0_106] : memref<2x5xf32, #tpu.memory_space<vmem>>, vector<2x5xf32>
    %304 = vector.broadcast %10 : vector<1x5xf32> to vector<2x5xf32>
    %305 = arith.mulf %304, %303 : vector<2x5xf32>
    %306 = vector.shape_cast %305 : vector<2x5xf32> to vector<1x2x5xf32>
    %cst_107 = arith.constant dense<0.000000e+00> : vector<1xf32>
    %307 = vector.multi_reduction <add>, %306, %cst_107 [1, 2] : vector<1x2x5xf32> to vector<1xf32>
    %308 = vector.shape_cast %307 : vector<1xf32> to vector<1x1x1xf32>
    %309 = vector.extract %308[0, 0, 0] : f32 from vector<1x1x1xf32>
    %310 = vector.broadcast %309 : f32 to vector<1x1xf32>
    %311 = arith.addf %302, %310 : vector<1x1xf32>
    %312 = tpu.iota {dimensions = array<i32: 0>} : vector<2x1xi32>
    %c0_i32 = arith.constant 0 : i32
    %313 = vector.broadcast %c0_i32 : i32 to vector<2x1xi32>
    %314 = arith.cmpi eq, %312, %313 : vector<2x1xi32>
    %315 = arith.extui %314 : vector<2x1xi1> to vector<2x1xi32>
    %316 = arith.sitofp %315 : vector<2x1xi32> to vector<2x1xf32>
    %c1_i32 = arith.constant 1 : i32
    %317 = vector.broadcast %c1_i32 : i32 to vector<2x1xi32>
    %318 = arith.cmpi eq, %312, %317 : vector<2x1xi32>
    %319 = arith.extui %318 : vector<2x1xi1> to vector<2x1xi32>
    %320 = arith.sitofp %319 : vector<2x1xi32> to vector<2x1xf32>
    %321 = vector.extract_strided_slice %130 {offsets = [0, 0], sizes = [1, 5], strides = [1, 1]} : vector<8x5xf32> to vector<1x5xf32>
    %322 = vector.extract_strided_slice %265 {offsets = [0, 0], sizes = [1, 5], strides = [1, 1]} : vector<8x5xf32> to vector<1x5xf32>
    %323 = vector.broadcast %316 : vector<2x1xf32> to vector<2x5xf32>
    %324 = vector.broadcast %321 : vector<1x5xf32> to vector<2x5xf32>
    %325 = arith.mulf %323, %324 : vector<2x5xf32>
    %326 = vector.broadcast %320 : vector<2x1xf32> to vector<2x5xf32>
    %327 = vector.broadcast %322 : vector<1x5xf32> to vector<2x5xf32>
    %328 = arith.mulf %326, %327 : vector<2x5xf32>
    %329 = arith.addf %325, %328 : vector<2x5xf32>
    %330 = vector.broadcast %9 : vector<1x5xf32> to vector<2x5xf32>
    %331 = arith.addf %330, %329 : vector<2x5xf32>
    %332 = vector.extract_strided_slice %130 {offsets = [1, 0], sizes = [1, 5], strides = [1, 1]} : vector<8x5xf32> to vector<1x5xf32>
    %333 = vector.extract_strided_slice %265 {offsets = [1, 0], sizes = [1, 5], strides = [1, 1]} : vector<8x5xf32> to vector<1x5xf32>
    %334 = vector.broadcast %316 : vector<2x1xf32> to vector<2x5xf32>
    %335 = vector.broadcast %332 : vector<1x5xf32> to vector<2x5xf32>
    %336 = arith.mulf %334, %335 : vector<2x5xf32>
    %337 = vector.broadcast %320 : vector<2x1xf32> to vector<2x5xf32>
    %338 = vector.broadcast %333 : vector<1x5xf32> to vector<2x5xf32>
    %339 = arith.mulf %337, %338 : vector<2x5xf32>
    %340 = arith.addf %336, %339 : vector<2x5xf32>
    %cst_108 = arith.constant dense<0xFF800000> : vector<2xf32>
    %341 = vector.multi_reduction <maximumf>, %331, %cst_108 [1] : vector<2x5xf32> to vector<2xf32>
    %342 = vector.shape_cast %341 : vector<2xf32> to vector<2x1xf32>
    %343 = vector.broadcast %342 : vector<2x1xf32> to vector<2x5xf32>
    %344 = arith.subf %331, %343 : vector<2x5xf32>
    %345 = math.exp %344 : vector<2x5xf32>
    %cst_109 = arith.constant dense<0.000000e+00> : vector<2x5xf32>
    %346 = tpu.matmul %345, %31, %cst_109 {dimension_numbers = #tpu.dot_dimension_numbers<[1], [0], [0], [1], [0, 0, 1, 1], [], []>} : vector<2x5xf32>, vector<5x5xf32>, vector<2x5xf32> -> vector<2x5xf32>
    %347 = vector.broadcast %28 : vector<1x1xf32> to vector<2x1xf32>
    %348 = arith.addf %342, %347 : vector<2x1xf32>
    %349 = math.log %346 : vector<2x5xf32>
    %350 = vector.broadcast %348 : vector<2x1xf32> to vector<2x5xf32>
    %351 = arith.addf %350, %349 : vector<2x5xf32>
    %352 = arith.addf %351, %340 : vector<2x5xf32>
    %353 = vector.extract_strided_slice %19 {offsets = [0, 1], sizes = [2, 1], strides = [1, 1]} : vector<2x8xf32> to vector<2x1xf32>
    %354 = vector.broadcast %353 : vector<2x1xf32> to vector<2x5xf32>
    %355 = arith.mulf %354, %352 : vector<2x5xf32>
    %cst_110 = arith.constant 1.000000e+00 : f32
    %356 = vector.broadcast %cst_110 : f32 to vector<2x1xf32>
    %357 = arith.subf %356, %353 : vector<2x1xf32>
    %358 = vector.broadcast %357 : vector<2x1xf32> to vector<2x5xf32>
    %359 = arith.mulf %358, %331 : vector<2x5xf32>
    %360 = arith.addf %355, %359 : vector<2x5xf32>
    %361 = vector.extract_strided_slice %130 {offsets = [2, 0], sizes = [1, 5], strides = [1, 1]} : vector<8x5xf32> to vector<1x5xf32>
    %362 = vector.extract_strided_slice %265 {offsets = [2, 0], sizes = [1, 5], strides = [1, 1]} : vector<8x5xf32> to vector<1x5xf32>
    %363 = vector.broadcast %316 : vector<2x1xf32> to vector<2x5xf32>
    %364 = vector.broadcast %361 : vector<1x5xf32> to vector<2x5xf32>
    %365 = arith.mulf %363, %364 : vector<2x5xf32>
    %366 = vector.broadcast %320 : vector<2x1xf32> to vector<2x5xf32>
    %367 = vector.broadcast %362 : vector<1x5xf32> to vector<2x5xf32>
    %368 = arith.mulf %366, %367 : vector<2x5xf32>
    %369 = arith.addf %365, %368 : vector<2x5xf32>
    %cst_111 = arith.constant dense<0xFF800000> : vector<2xf32>
    %370 = vector.multi_reduction <maximumf>, %360, %cst_111 [1] : vector<2x5xf32> to vector<2xf32>
    %371 = vector.shape_cast %370 : vector<2xf32> to vector<2x1xf32>
    %372 = vector.broadcast %371 : vector<2x1xf32> to vector<2x5xf32>
    %373 = arith.subf %360, %372 : vector<2x5xf32>
    %374 = math.exp %373 : vector<2x5xf32>
    %cst_112 = arith.constant dense<0.000000e+00> : vector<2x5xf32>
    %375 = tpu.matmul %374, %31, %cst_112 {dimension_numbers = #tpu.dot_dimension_numbers<[1], [0], [0], [1], [0, 0, 1, 1], [], []>} : vector<2x5xf32>, vector<5x5xf32>, vector<2x5xf32> -> vector<2x5xf32>
    %376 = vector.broadcast %28 : vector<1x1xf32> to vector<2x1xf32>
    %377 = arith.addf %371, %376 : vector<2x1xf32>
    %378 = math.log %375 : vector<2x5xf32>
    %379 = vector.broadcast %377 : vector<2x1xf32> to vector<2x5xf32>
    %380 = arith.addf %379, %378 : vector<2x5xf32>
    %381 = arith.addf %380, %369 : vector<2x5xf32>
    %382 = vector.extract_strided_slice %19 {offsets = [0, 2], sizes = [2, 1], strides = [1, 1]} : vector<2x8xf32> to vector<2x1xf32>
    %383 = vector.broadcast %382 : vector<2x1xf32> to vector<2x5xf32>
    %384 = arith.mulf %383, %381 : vector<2x5xf32>
    %cst_113 = arith.constant 1.000000e+00 : f32
    %385 = vector.broadcast %cst_113 : f32 to vector<2x1xf32>
    %386 = arith.subf %385, %382 : vector<2x1xf32>
    %387 = vector.broadcast %386 : vector<2x1xf32> to vector<2x5xf32>
    %388 = arith.mulf %387, %360 : vector<2x5xf32>
    %389 = arith.addf %384, %388 : vector<2x5xf32>
    %390 = vector.extract_strided_slice %130 {offsets = [3, 0], sizes = [1, 5], strides = [1, 1]} : vector<8x5xf32> to vector<1x5xf32>
    %391 = vector.extract_strided_slice %265 {offsets = [3, 0], sizes = [1, 5], strides = [1, 1]} : vector<8x5xf32> to vector<1x5xf32>
    %392 = vector.broadcast %316 : vector<2x1xf32> to vector<2x5xf32>
    %393 = vector.broadcast %390 : vector<1x5xf32> to vector<2x5xf32>
    %394 = arith.mulf %392, %393 : vector<2x5xf32>
    %395 = vector.broadcast %320 : vector<2x1xf32> to vector<2x5xf32>
    %396 = vector.broadcast %391 : vector<1x5xf32> to vector<2x5xf32>
    %397 = arith.mulf %395, %396 : vector<2x5xf32>
    %398 = arith.addf %394, %397 : vector<2x5xf32>
    %cst_114 = arith.constant dense<0xFF800000> : vector<2xf32>
    %399 = vector.multi_reduction <maximumf>, %389, %cst_114 [1] : vector<2x5xf32> to vector<2xf32>
    %400 = vector.shape_cast %399 : vector<2xf32> to vector<2x1xf32>
    %401 = vector.broadcast %400 : vector<2x1xf32> to vector<2x5xf32>
    %402 = arith.subf %389, %401 : vector<2x5xf32>
    %403 = math.exp %402 : vector<2x5xf32>
    %cst_115 = arith.constant dense<0.000000e+00> : vector<2x5xf32>
    %404 = tpu.matmul %403, %31, %cst_115 {dimension_numbers = #tpu.dot_dimension_numbers<[1], [0], [0], [1], [0, 0, 1, 1], [], []>} : vector<2x5xf32>, vector<5x5xf32>, vector<2x5xf32> -> vector<2x5xf32>
    %405 = vector.broadcast %28 : vector<1x1xf32> to vector<2x1xf32>
    %406 = arith.addf %400, %405 : vector<2x1xf32>
    %407 = math.log %404 : vector<2x5xf32>
    %408 = vector.broadcast %406 : vector<2x1xf32> to vector<2x5xf32>
    %409 = arith.addf %408, %407 : vector<2x5xf32>
    %410 = arith.addf %409, %398 : vector<2x5xf32>
    %411 = vector.extract_strided_slice %19 {offsets = [0, 3], sizes = [2, 1], strides = [1, 1]} : vector<2x8xf32> to vector<2x1xf32>
    %412 = vector.broadcast %411 : vector<2x1xf32> to vector<2x5xf32>
    %413 = arith.mulf %412, %410 : vector<2x5xf32>
    %cst_116 = arith.constant 1.000000e+00 : f32
    %414 = vector.broadcast %cst_116 : f32 to vector<2x1xf32>
    %415 = arith.subf %414, %411 : vector<2x1xf32>
    %416 = vector.broadcast %415 : vector<2x1xf32> to vector<2x5xf32>
    %417 = arith.mulf %416, %389 : vector<2x5xf32>
    %418 = arith.addf %413, %417 : vector<2x5xf32>
    %419 = vector.extract_strided_slice %130 {offsets = [4, 0], sizes = [1, 5], strides = [1, 1]} : vector<8x5xf32> to vector<1x5xf32>
    %420 = vector.extract_strided_slice %265 {offsets = [4, 0], sizes = [1, 5], strides = [1, 1]} : vector<8x5xf32> to vector<1x5xf32>
    %421 = vector.broadcast %316 : vector<2x1xf32> to vector<2x5xf32>
    %422 = vector.broadcast %419 : vector<1x5xf32> to vector<2x5xf32>
    %423 = arith.mulf %421, %422 : vector<2x5xf32>
    %424 = vector.broadcast %320 : vector<2x1xf32> to vector<2x5xf32>
    %425 = vector.broadcast %420 : vector<1x5xf32> to vector<2x5xf32>
    %426 = arith.mulf %424, %425 : vector<2x5xf32>
    %427 = arith.addf %423, %426 : vector<2x5xf32>
    %cst_117 = arith.constant dense<0xFF800000> : vector<2xf32>
    %428 = vector.multi_reduction <maximumf>, %418, %cst_117 [1] : vector<2x5xf32> to vector<2xf32>
    %429 = vector.shape_cast %428 : vector<2xf32> to vector<2x1xf32>
    %430 = vector.broadcast %429 : vector<2x1xf32> to vector<2x5xf32>
    %431 = arith.subf %418, %430 : vector<2x5xf32>
    %432 = math.exp %431 : vector<2x5xf32>
    %cst_118 = arith.constant dense<0.000000e+00> : vector<2x5xf32>
    %433 = tpu.matmul %432, %31, %cst_118 {dimension_numbers = #tpu.dot_dimension_numbers<[1], [0], [0], [1], [0, 0, 1, 1], [], []>} : vector<2x5xf32>, vector<5x5xf32>, vector<2x5xf32> -> vector<2x5xf32>
    %434 = vector.broadcast %28 : vector<1x1xf32> to vector<2x1xf32>
    %435 = arith.addf %429, %434 : vector<2x1xf32>
    %436 = math.log %433 : vector<2x5xf32>
    %437 = vector.broadcast %435 : vector<2x1xf32> to vector<2x5xf32>
    %438 = arith.addf %437, %436 : vector<2x5xf32>
    %439 = arith.addf %438, %427 : vector<2x5xf32>
    %440 = vector.extract_strided_slice %19 {offsets = [0, 4], sizes = [2, 1], strides = [1, 1]} : vector<2x8xf32> to vector<2x1xf32>
    %441 = vector.broadcast %440 : vector<2x1xf32> to vector<2x5xf32>
    %442 = arith.mulf %441, %439 : vector<2x5xf32>
    %cst_119 = arith.constant 1.000000e+00 : f32
    %443 = vector.broadcast %cst_119 : f32 to vector<2x1xf32>
    %444 = arith.subf %443, %440 : vector<2x1xf32>
    %445 = vector.broadcast %444 : vector<2x1xf32> to vector<2x5xf32>
    %446 = arith.mulf %445, %418 : vector<2x5xf32>
    %447 = arith.addf %442, %446 : vector<2x5xf32>
    %448 = vector.extract_strided_slice %130 {offsets = [5, 0], sizes = [1, 5], strides = [1, 1]} : vector<8x5xf32> to vector<1x5xf32>
    %449 = vector.extract_strided_slice %265 {offsets = [5, 0], sizes = [1, 5], strides = [1, 1]} : vector<8x5xf32> to vector<1x5xf32>
    %450 = vector.broadcast %316 : vector<2x1xf32> to vector<2x5xf32>
    %451 = vector.broadcast %448 : vector<1x5xf32> to vector<2x5xf32>
    %452 = arith.mulf %450, %451 : vector<2x5xf32>
    %453 = vector.broadcast %320 : vector<2x1xf32> to vector<2x5xf32>
    %454 = vector.broadcast %449 : vector<1x5xf32> to vector<2x5xf32>
    %455 = arith.mulf %453, %454 : vector<2x5xf32>
    %456 = arith.addf %452, %455 : vector<2x5xf32>
    %cst_120 = arith.constant dense<0xFF800000> : vector<2xf32>
    %457 = vector.multi_reduction <maximumf>, %447, %cst_120 [1] : vector<2x5xf32> to vector<2xf32>
    %458 = vector.shape_cast %457 : vector<2xf32> to vector<2x1xf32>
    %459 = vector.broadcast %458 : vector<2x1xf32> to vector<2x5xf32>
    %460 = arith.subf %447, %459 : vector<2x5xf32>
    %461 = math.exp %460 : vector<2x5xf32>
    %cst_121 = arith.constant dense<0.000000e+00> : vector<2x5xf32>
    %462 = tpu.matmul %461, %31, %cst_121 {dimension_numbers = #tpu.dot_dimension_numbers<[1], [0], [0], [1], [0, 0, 1, 1], [], []>} : vector<2x5xf32>, vector<5x5xf32>, vector<2x5xf32> -> vector<2x5xf32>
    %463 = vector.broadcast %28 : vector<1x1xf32> to vector<2x1xf32>
    %464 = arith.addf %458, %463 : vector<2x1xf32>
    %465 = math.log %462 : vector<2x5xf32>
    %466 = vector.broadcast %464 : vector<2x1xf32> to vector<2x5xf32>
    %467 = arith.addf %466, %465 : vector<2x5xf32>
    %468 = arith.addf %467, %456 : vector<2x5xf32>
    %469 = vector.extract_strided_slice %19 {offsets = [0, 5], sizes = [2, 1], strides = [1, 1]} : vector<2x8xf32> to vector<2x1xf32>
    %470 = vector.broadcast %469 : vector<2x1xf32> to vector<2x5xf32>
    %471 = arith.mulf %470, %468 : vector<2x5xf32>
    %cst_122 = arith.constant 1.000000e+00 : f32
    %472 = vector.broadcast %cst_122 : f32 to vector<2x1xf32>
    %473 = arith.subf %472, %469 : vector<2x1xf32>
    %474 = vector.broadcast %473 : vector<2x1xf32> to vector<2x5xf32>
    %475 = arith.mulf %474, %447 : vector<2x5xf32>
    %476 = arith.addf %471, %475 : vector<2x5xf32>
    %477 = vector.extract_strided_slice %130 {offsets = [6, 0], sizes = [1, 5], strides = [1, 1]} : vector<8x5xf32> to vector<1x5xf32>
    %478 = vector.extract_strided_slice %265 {offsets = [6, 0], sizes = [1, 5], strides = [1, 1]} : vector<8x5xf32> to vector<1x5xf32>
    %479 = vector.broadcast %316 : vector<2x1xf32> to vector<2x5xf32>
    %480 = vector.broadcast %477 : vector<1x5xf32> to vector<2x5xf32>
    %481 = arith.mulf %479, %480 : vector<2x5xf32>
    %482 = vector.broadcast %320 : vector<2x1xf32> to vector<2x5xf32>
    %483 = vector.broadcast %478 : vector<1x5xf32> to vector<2x5xf32>
    %484 = arith.mulf %482, %483 : vector<2x5xf32>
    %485 = arith.addf %481, %484 : vector<2x5xf32>
    %cst_123 = arith.constant dense<0xFF800000> : vector<2xf32>
    %486 = vector.multi_reduction <maximumf>, %476, %cst_123 [1] : vector<2x5xf32> to vector<2xf32>
    %487 = vector.shape_cast %486 : vector<2xf32> to vector<2x1xf32>
    %488 = vector.broadcast %487 : vector<2x1xf32> to vector<2x5xf32>
    %489 = arith.subf %476, %488 : vector<2x5xf32>
    %490 = math.exp %489 : vector<2x5xf32>
    %cst_124 = arith.constant dense<0.000000e+00> : vector<2x5xf32>
    %491 = tpu.matmul %490, %31, %cst_124 {dimension_numbers = #tpu.dot_dimension_numbers<[1], [0], [0], [1], [0, 0, 1, 1], [], []>} : vector<2x5xf32>, vector<5x5xf32>, vector<2x5xf32> -> vector<2x5xf32>
    %492 = vector.broadcast %28 : vector<1x1xf32> to vector<2x1xf32>
    %493 = arith.addf %487, %492 : vector<2x1xf32>
    %494 = math.log %491 : vector<2x5xf32>
    %495 = vector.broadcast %493 : vector<2x1xf32> to vector<2x5xf32>
    %496 = arith.addf %495, %494 : vector<2x5xf32>
    %497 = arith.addf %496, %485 : vector<2x5xf32>
    %498 = vector.extract_strided_slice %19 {offsets = [0, 6], sizes = [2, 1], strides = [1, 1]} : vector<2x8xf32> to vector<2x1xf32>
    %499 = vector.broadcast %498 : vector<2x1xf32> to vector<2x5xf32>
    %500 = arith.mulf %499, %497 : vector<2x5xf32>
    %cst_125 = arith.constant 1.000000e+00 : f32
    %501 = vector.broadcast %cst_125 : f32 to vector<2x1xf32>
    %502 = arith.subf %501, %498 : vector<2x1xf32>
    %503 = vector.broadcast %502 : vector<2x1xf32> to vector<2x5xf32>
    %504 = arith.mulf %503, %476 : vector<2x5xf32>
    %505 = arith.addf %500, %504 : vector<2x5xf32>
    %506 = vector.extract_strided_slice %130 {offsets = [7, 0], sizes = [1, 5], strides = [1, 1]} : vector<8x5xf32> to vector<1x5xf32>
    %507 = vector.extract_strided_slice %265 {offsets = [7, 0], sizes = [1, 5], strides = [1, 1]} : vector<8x5xf32> to vector<1x5xf32>
    %508 = vector.broadcast %316 : vector<2x1xf32> to vector<2x5xf32>
    %509 = vector.broadcast %506 : vector<1x5xf32> to vector<2x5xf32>
    %510 = arith.mulf %508, %509 : vector<2x5xf32>
    %511 = vector.broadcast %320 : vector<2x1xf32> to vector<2x5xf32>
    %512 = vector.broadcast %507 : vector<1x5xf32> to vector<2x5xf32>
    %513 = arith.mulf %511, %512 : vector<2x5xf32>
    %514 = arith.addf %510, %513 : vector<2x5xf32>
    %cst_126 = arith.constant dense<0xFF800000> : vector<2xf32>
    %515 = vector.multi_reduction <maximumf>, %505, %cst_126 [1] : vector<2x5xf32> to vector<2xf32>
    %516 = vector.shape_cast %515 : vector<2xf32> to vector<2x1xf32>
    %517 = vector.broadcast %516 : vector<2x1xf32> to vector<2x5xf32>
    %518 = arith.subf %505, %517 : vector<2x5xf32>
    %519 = math.exp %518 : vector<2x5xf32>
    %cst_127 = arith.constant dense<0.000000e+00> : vector<2x5xf32>
    %520 = tpu.matmul %519, %31, %cst_127 {dimension_numbers = #tpu.dot_dimension_numbers<[1], [0], [0], [1], [0, 0, 1, 1], [], []>} : vector<2x5xf32>, vector<5x5xf32>, vector<2x5xf32> -> vector<2x5xf32>
    %521 = vector.broadcast %28 : vector<1x1xf32> to vector<2x1xf32>
    %522 = arith.addf %516, %521 : vector<2x1xf32>
    %523 = math.log %520 : vector<2x5xf32>
    %524 = vector.broadcast %522 : vector<2x1xf32> to vector<2x5xf32>
    %525 = arith.addf %524, %523 : vector<2x5xf32>
    %526 = arith.addf %525, %514 : vector<2x5xf32>
    %527 = vector.extract_strided_slice %19 {offsets = [0, 7], sizes = [2, 1], strides = [1, 1]} : vector<2x8xf32> to vector<2x1xf32>
    %528 = vector.broadcast %527 : vector<2x1xf32> to vector<2x5xf32>
    %529 = arith.mulf %528, %526 : vector<2x5xf32>
    %cst_128 = arith.constant 1.000000e+00 : f32
    %530 = vector.broadcast %cst_128 : f32 to vector<2x1xf32>
    %531 = arith.subf %530, %527 : vector<2x1xf32>
    %532 = vector.broadcast %531 : vector<2x1xf32> to vector<2x5xf32>
    %533 = arith.mulf %532, %505 : vector<2x5xf32>
    %534 = arith.addf %529, %533 : vector<2x5xf32>
    %535 = vector.broadcast %10 : vector<1x5xf32> to vector<2x5xf32>
    %536 = arith.addf %534, %535 : vector<2x5xf32>
    %cst_129 = arith.constant dense<0xFF800000> : vector<2xf32>
    %537 = vector.multi_reduction <maximumf>, %536, %cst_129 [1] : vector<2x5xf32> to vector<2xf32>
    %538 = vector.shape_cast %537 : vector<2xf32> to vector<2x1xf32>
    %539 = vector.broadcast %538 : vector<2x1xf32> to vector<2x5xf32>
    %540 = arith.subf %536, %539 : vector<2x5xf32>
    %541 = math.exp %540 : vector<2x5xf32>
    %cst_130 = arith.constant dense<0.000000e+00> : vector<2xf32>
    %542 = vector.multi_reduction <add>, %541, %cst_130 [1] : vector<2x5xf32> to vector<2xf32>
    %543 = vector.shape_cast %542 : vector<2xf32> to vector<2x1xf32>
    %544 = math.log %543 : vector<2x1xf32>
    %545 = arith.addf %538, %544 : vector<2x1xf32>
    %546 = vector.shape_cast %545 : vector<2x1xf32> to vector<1x2x1xf32>
    %cst_131 = arith.constant dense<0.000000e+00> : vector<1xf32>
    %547 = vector.multi_reduction <add>, %546, %cst_131 [1, 2] : vector<1x2x1xf32> to vector<1xf32>
    %548 = vector.shape_cast %547 : vector<1xf32> to vector<1x1x1xf32>
    %549 = vector.extract %548[0, 0, 0] : f32 from vector<1x1x1xf32>
    %550 = vector.broadcast %549 : f32 to vector<1x1xf32>
    %551 = arith.subf %311, %550 : vector<1x1xf32>
    %c0_132 = arith.constant 0 : index
    %c0_133 = arith.constant 0 : index
    %552 = vector.load %arg16[%c0_132, %c0_133] : memref<1x1xf32, #tpu.memory_space<vmem>>, vector<1x1xf32>
    tpu.vector_store %arg16[%c0_132, %c0_133], %551 {strides = array<i32>} : memref<1x1xf32, #tpu.memory_space<vmem>>, vector<1x1xf32>,
    return
  }
}

</mosaic_0001>

<bundles_post_ra>
// kernel: tpu_custom_call.1
= control target key start
LH: loop header
LB: loop body
LE: loop exit
PB: predicated region body
PF: predicated region fallthrough
CT: control target
= control target key end

     0   :  { %s3628_s0 = inlined_call_operand.vmem [shape: f32[2,8,32], index: 0, kind: input, shape index: {}]   ;;  %s3629_s1 = inlined_call_operand.hbm [shape: f32[2,8], index: 1, kind: input, shape index: {}]   ;;  %s3630_s2 = inlined_call_operand.vmem [shape: f32[2,8,1], index: 2, kind: input, shape index: {}]   ;;  %s3631_s3 = inlined_call_operand.vmem [shape: f32[2,8,5], index: 3, kind: input, shape index: {}]   ;;  %s3632_s4 = inlined_call_operand.vmem [shape: f32[2,5], index: 4, kind: input, shape index: {}]   ;;  %s3633_s5 = inlined_call_operand.vmem [shape: f32[32,96], index: 5, kind: input, shape index: {}]   ;;  %s3634_s6 = inlined_call_operand.vmem [shape: f32[1,96], index: 6, kind: input, shape index: {}]   ;;  %s3635_s7 = inlined_call_operand.vmem [shape: f32[32,32], index: 7, kind: input, shape index: {}]   ;;  %s3636_s8 = inlined_call_operand.vmem [shape: f32[32,64], index: 8, kind: input, shape index: {}]   ;;  %s3637_s9 = inlined_call_operand.vmem [shape: f32[1,64], index: 9, kind: input, shape index: {}]   ;;  %s3638_s10 = inlined_call_operand.vmem [shape: f32[64,32], index: 10, kind: input, shape index: {}]   ;;  %s3639_s11 = inlined_call_operand.vmem [shape: f32[32,5], index: 11, kind: input, shape index: {}]   ;;  %s3640_s12 = inlined_call_operand.vmem [shape: f32[6,32], index: 12, kind: input, shape index: {}]   ;;  %s3641_s13 = inlined_call_operand.vmem [shape: f32[3,5], index: 13, kind: input, shape index: {}]   ;;  %s3642_s14 = inlined_call_operand.vmem [shape: f32[5,5], index: 14, kind: input, shape index: {}]   ;;  %s3643_s15 = inlined_call_operand.vmem [shape: f32[2,8,5], index: 15, kind: output, shape index: {0}]   ;;  %s3644_s16 = inlined_call_operand.hbm [shape: f32[1,1], index: 16, kind: output, shape index: {1}]  }
   0x1   :  { %3646 = sst [smem:[#allocation8_spill]] %s3628_s0 }
   0x2   :  { %22 = vsyncpa [#allocation3], 0 }
   0x3   :  { %23 = vsyncpa [#allocation4], 0  ;;  %s2884_s21 = smov [#allocation2]  }
   0x4   :  { %s32_s22 = sshll.u32 %s2884_s21, 4  ;;  %s33_s22 = int_to_ptr.vmem [resolvable:$true] %s32_s22 }
   0x5   :  { %s2848_s23 = scalar_lea.vmem %s33_s22, 32  ;;  %p2853_p1 = scmp.lt.s32.totalorder %s33_s22, %s33_s22 }
   0x6   :  { %p2849_p0 = scmp.ne.s32.totalorder %s33_s22, %s2848_s23  ;;  %p2854_p2 = scmp.lt.s32.totalorder %s2848_s23, %s2848_s23 }
   0x8   :  { %p2855_p3 = por %p2854_p2, %p2853_p1 }
   0xa   :  { %p2856_p4 = pnand %p2855_p3, %p2849_p0 }
   0xc   :  { %2859 = shalt.err (!%p2856_p4)
}
   0xd   :  { %35 = dma.hbm_to_vmem [thread:$0]  %s3629_s1, 32, %s33_s22, [#allocation3]  }
   0xe   :  { %2880 = dma.done.wait [#allocation3], 32  }
   0xf   :  { %2881 = vsyncadd [#allocation3], 4294967264  ;;  %v2885_v0 = vmov 0.0   ;;  %vm2886_vm0 = vmmov 0   ;;  %v2995_v1 = vld [vmem:[%s3633_s5 + $0x18] sm:$0xff]  ;;  %v3000_v2 = vld [vmem:[%s3633_s5 + $0x10] sm:$0xff]  ;;  %v193_v11 = vlaneseq }
  0x10   :  { %2550 = vmatprep.subr.mxu0 %v2885_v0  ;;  %2558 = vmatprep.mubr.msk.f32.mxu0 %vm2886_vm0, %v2885_v0  ;;  %v3007_v3 = vld [vmem:[%s3633_s5 + $0x8] sm:$0xff]  ;;  %v3014_v4 = vld [vmem:[%s3633_s5] sm:$0xff]  ;;  %s3647_s20 = sld [smem:[#allocation8_spill]]  ;;  %vm119_vm1 = vcmask 261120   ;;  %s2887_s22 = smov 96   ;;  %vm274_vm2 = vcmask 64512  }
  0x11   :  { %2561 = vmatprep.subr.mxu1 %v2885_v0  ;;  %2563 = vmatprep.mubr.msk.f32.mxu1 %vm2886_vm0, %v2885_v0  ;;  %v3032_v6 = vld [vmem:[%s3634_s6] ss:$0 sm:$0xff]  ;;  %v3044_v14 = vshrl.u32 %v193_v11, 7  ;;  %s2888_s6 = smov 64   ;;  %v3059_v27 = vld [vmem:[%s3635_s7 + $0x18] sm:$0xff]  ;;  %v3064_v28 = vld [vmem:[%s3635_s7 + $0x10] sm:$0xff] }
  0x12   :  { %2551 = vmatpush3.msra.mxu0 %v2995_v1  ;;  %v3041_v12 = vld [vmem:[#allocation2] sm:$0x3]  ;;  %v3071_v29 = vld [vmem:[%s3635_s7 + $0x8] sm:$0xff]  ;;  %v3107_v49 = vld [vmem:[%s3636_s8 + $0x18] sm:$0xff]  ;;  %vm556_vm3 = vcmask 523264   ;;  %vm759_vm5 = vcmask 1044480  }
  0x13   :  { %2552 = vmatprep.subr.mxu0 %v2885_v0  ;;  %v2423_v13 = vadd.f32 -1.0, %v3041_v12  ;;  %v3049_v16 = vsub.s32 0, %v3044_v14  ;;  %v3084_v34 = vld [vmem:[%s3635_s7] sm:$0xff]  ;;  %v3114_v50 = vld [vmem:[%s3636_s8 + $0x10] sm:$0xff]  ;;  %v3119_v51 = vld [vmem:[%s3636_s8 + $0x8] sm:$0xff]  ;;  %v3133_v56 = vsub.s32 1, %v3044_v14 }
  0x14   :  { %2553 = vmatpush3.msra.mxu0 %v3000_v2  ;;  %v3094_v37 = vld [vmem:[%s3640_s12] sm:$0x3f]  ;;  %v3136_v57 = vsub.s32 2, %v3044_v14  ;;  %v3189_v11 = vld [vmem:[%s3638_s10 + $0x10] sm:$0xff]  ;;  %vm734_vm6 = vcmask 39936   ;;  %vm1606_vm7 = vcmp.eq.s32.totalorder %v3044_v14, 0 }
  0x15   :  { %2554 = vmatprep.subr.mxu0 %v2885_v0  ;;  %v3046_v15 = vmul.f32 1e+09, %v2423_v13  ;;  %v3098_v38 = vrot.slane %v3094_v37, %v3049_v16  ;;  %v3126_v52 = vld [vmem:[%s3636_s8] sm:$0xff]  ;;  %v3140_v58 = vrot.slane %v3094_v37, %v3133_v56  ;;  %v3196_v13 = vld [vmem:[%s3638_s10 + $0x8] sm:$0xff]  ;;  %vm97_vm8 = vcmask 36864   ;;  %s2897_s27 = smov [#allocation5]  }
  0x16   :  { %2555 = vmatpush3.msra.mxu0 %v3007_v3  ;;  %v3020_v5 = vld [vmem:[%s3647_s20] sm:$0xff]  ;;  %v3144_v61 = vrot.slane %v3094_v37, %v3136_v57  ;;  %vm1609_vm10 = vcmp.eq.s32.totalorder %v3044_v14, 1  ;;  %vm1591_vm11 = vcmask 33792   ;;  %vm839_vm12 = vcmask 38912   ;;  %s2412_s1 = sshll.u32 %s2897_s27, 4  ;;  %s2413_s1 = int_to_ptr.vmem [resolvable:$true] %s2412_s1 }
  0x17   :  { %2556 = vmatprep.subr.mxu0 %v2885_v0  ;;  %v196_v17 = vrot.slane %v3046_v15, %v3049_v16  ;;  %vm857_vm13 = vcmask 32768   ;;  %vm2389_vm14 = vcmask 1024   ;;  %vm2402_vm15 = vcmask 0   ;;  %s2860_s28 = scalar_lea.vmem %s2413_s1, 16  ;;  %s2864_s29 = scalar_lea.vmem %s2413_s1, 32 }
  0x18   :  { %2557 = vmatpush3.msra.mxu0 %v3014_v4  ;;  %p2861_p5 = scmp.ne.s32.totalorder %s2413_s1, %s2860_s28  ;;  %p2865_p6 = scmp.lt.s32.totalorder %s2413_s1, %s2413_s1 }
  0x19   :  { %2559 = vmatmul.mubr.msk.f32.vlgmr.msra.gmra.mxu0 %vm119_vm1, %v3020_v5  ;;  %2571 = vmatprep.subr.mxu0 %v2885_v0  ;;  %p2866_p7 = scmp.lt.s32.totalorder %s2864_s29, %s2860_s28 }
  0x1a   :  { %2579 = vmatprep.mubr.msk.f32.mxu0 %vm2886_vm0, %v2885_v0  ;;  %2572 = vmatpush3.msra.mxu0 %v3059_v27 }
  0x1b   :  { %2573 = vmatprep.subr.mxu0 %v2885_v0  ;;  %p2867_p8 = por %p2866_p7, %p2865_p6 }
  0x1c   :  { %2574 = vmatpush3.msra.mxu0 %v3064_v28 }
  0x1d   :  { %2575 = vmatprep.subr.mxu0 %v2885_v0  ;;  %p2868_p9 = pnand %p2867_p8, %p2861_p5 }
  0x1e   :  { %2576 = vmatpush3.msra.mxu0 %v3071_v29 }
  0x1f   :  { %2577 = vmatprep.subr.mxu0 %v2885_v0 }
  0x20   :  { %2578 = vmatpush3.msra.mxu0 %v3084_v34 }
  0x21   :  { %2593 = vmatprep.subr.mxu0 %v2885_v0 }
  0xd9   :  { %v189_v7 = vpop.f32.mrf.mxu0 }
  0xda   :  { %v190_v8 = vadd.f32 %v3032_v6, %v189_v7  ;;  %v3161_v7 = vld [vmem:[%s3638_s10 + $0x30] sm:$0xff] }
  0xdb   :  { %v2560_v9 = vpop.f32.mrf.mxu0 }
  0xdc   :  { %198 = vrot.lane.b32.xlu0 %v190_v8, %s2887_s22  ;;  %v3175_v9 = vld [vmem:[%s3638_s10 + $0x20] sm:$0xff] }
 0x14e   :  { %v199_v10 = vpop.permute.xlu0 %198 }
 0x14f   :  { %2562 = vmatpush3.xpose.msk.msra.mxu1 %vm119_vm1, %v199_v10  ;;  %v3182_v10 = vld [vmem:[%s3638_s10 + $0x18] sm:$0xff] }
 0x150   :  { %2566 = vmatprep.subr.mxu1 %v2885_v0 }
 0x152   :  { %2564 = vmatmul.mubr.msk.f32.vlgmr.msra.gmra.mxu1 %vm119_vm1, %v190_v8 }
 0x153   :  { %2568 = vmatprep.mubr.msk.f32.mxu1 %vm2886_vm0, %v2885_v0 }
 0x212   :  { %v270_v18 = vpop.f32.mrf.mxu1 }
 0x213   :  { %v271_v19 = vadd.f32 %v270_v18, %v196_v17  ;;  %v3203_v17 = vld [vmem:[%s3638_s10] sm:$0xff] }
 0x214   :  { %v2565_v20 = vpop.f32.mrf.mxu1  ;;  %v3210_v18 = vld [vmem:[%s3637_s9] ss:$0 sm:$0xff] }
 0x215   :  { %v275_v21 = vsel %vm274_vm2, %v271_v19, -inf }
 0x216   :  { %276 = vmax.xlane.f32.xlu0 %v275_v21 }
 0x29f   :  { %v277_v22 = vpop.xlane.xlu0 %276 }
 0x2a0   :  { %v278_v23 = vsub.f32 %v271_v19, %v277_v22 }
 0x2a2   :  { %v279_v24 = vmul.f32 1.442695, %v278_v23 }
 0x2a4   :  { %2785 = vpow2.f32 %v279_v24 }
 0x2b1   :  { %v2786_v25 = vpop.eup %2785 }
 0x2b2   :  { %v281_v26 = vsel %vm274_vm2, %v2786_v25, 0.0 }
 0x2b3   :  { %282 = vadd.xlane.f32.xlu1 %v281_v26 }
 0x2c4   :  { %286 = vrot.lane.b32.xlu1 %v190_v8, %s2888_s6  ;;  %v3168_v8 = vld [vmem:[%s3638_s10 + $0x28] sm:$0xff] }
 0x33c   :  { %v283_v30 = vpop.xlane.xlu1 %282 }
 0x33d   :  { %2787 = vrcp.f32 %v283_v30 }
 0x340   :  { %v287_v31 = vpop.permute.xlu1 %286 }
 0x341   :  { %2567 = vmatpush3.msra.mxu1 %v287_v31 }
 0x342   :  { %2582 = vmatprep.subr.mxu1 %v2885_v0 }
 0x34a   :  { %v2788_v32 = vpop.eup %2787 }
 0x34b   :  { %v285_v33 = vmul.f32 %v2788_v32, %v2786_v25 }
 0x34d   :  { %2569 = vmatmul.mubr.msk.f32.vlgmr.msra.gmra.mxu1 %vm274_vm2, %v285_v33 }
 0x34e   :  { %2590 = vmatprep.mubr.msk.f32.mxu1 %vm2886_vm0, %v2885_v0  ;;  %2583 = vmatpush3.msra.mxu1 %v3107_v49 }
 0x34f   :  { %2584 = vmatprep.subr.mxu1 %v2885_v0 }
 0x350   :  { %2585 = vmatpush3.msra.mxu1 %v3114_v50 }
 0x351   :  { %2586 = vmatprep.subr.mxu1 %v2885_v0 }
 0x352   :  { %2587 = vmatpush3.msra.mxu1 %v3119_v51 }
 0x353   :  { %2588 = vmatprep.subr.mxu1 %v2885_v0 }
 0x354   :  { %2589 = vmatpush3.msra.mxu1 %v3126_v52 }
 0x355   :  { %2612 = vmatprep.subr.mxu1 %v2885_v0 }
 0x40d   :  { %v358_v35 = vpop.f32.mrf.mxu1 }
 0x40e   :  { %2580 = vmatmul.mubr.msk.f32.vlgmr.msra.gmra.mxu0 %vm119_vm1, %v358_v35  ;;  %v3217_v35 = vsub.s32 3, %v3044_v14 }
 0x40f   :  { %v2570_v36 = vpop.f32.mrf.mxu1  ;;  %2609 = vmatprep.mubr.msk.f32.mxu0 %vm2886_vm0, %v2885_v0 }
 0x410   :  { %v3221_v36 = vrot.slane %v3094_v37, %v3217_v35 }
 0x4ce   :  { %v435_v39 = vpop.f32.mrf.mxu0 }
 0x4cf   :  { %v436_v40 = vadd.f32 %v435_v39, %v3098_v38 }
 0x4d0   :  { %v2581_v41 = vpop.f32.mrf.mxu0 }
 0x4d1   :  { %v439_v42 = vadd.f32 %v436_v40, %v3020_v5  ;;  %v3154_v5 = vld [vmem:[%s3638_s10 + $0x38] sm:$0xff] }
 0x4d2   :  { %2594 = vmatpush3.msra.mxu0 %v3154_v5 }
 0x4d3   :  { %v440_v43 = vsel %vm119_vm1, %v439_v42, 0.0  ;;  %2595 = vmatprep.subr.mxu0 %v2885_v0 }
 0x4d4   :  { %441 = vadd.xlane.f32.xlu1 %v440_v43  ;;  %2596 = vmatpush3.msra.mxu0 %v3161_v7 }
 0x4d5   :  { %2597 = vmatprep.subr.mxu0 %v2885_v0 }
 0x4d6   :  { %2598 = vmatpush3.msra.mxu0 %v3168_v8 }
 0x4d7   :  { %2599 = vmatprep.subr.mxu0 %v2885_v0 }
 0x4d8   :  { %2600 = vmatpush3.msra.mxu0 %v3175_v9 }
 0x4d9   :  { %2601 = vmatprep.subr.mxu0 %v2885_v0 }
 0x4da   :  { %2602 = vmatpush3.msra.mxu0 %v3182_v10 }
 0x4db   :  { %2603 = vmatprep.subr.mxu0 %v2885_v0 }
 0x4dc   :  { %2604 = vmatpush3.msra.mxu0 %v3189_v11 }
 0x4dd   :  { %2605 = vmatprep.subr.mxu0 %v2885_v0 }
 0x4de   :  { %2606 = vmatpush3.msra.mxu0 %v3196_v13 }
 0x4df   :  { %2607 = vmatprep.subr.mxu0 %v2885_v0 }
 0x4e0   :  { %2608 = vmatpush3.msra.mxu0 %v3203_v17 }
 0x4e1   :  { %2639 = vmatprep.subr.mxu0 %v2885_v0 }
 0x55d   :  { %v442_v44 = vpop.xlane.xlu1 %441 }
 0x55e   :  { %v444_v45 = vmul.f32 0.03125, %v442_v44 }
 0x560   :  { %v445_v46 = vsub.f32 %v439_v42, %v444_v45 }
 0x562   :  { %v446_v47 = vmul.f32 %v445_v46, %v445_v46 }
 0x564   :  { %v447_v48 = vsel %vm119_vm1, %v446_v47, 0.0 }
 0x565   :  { %448 = vadd.xlane.f32.xlu0 %v447_v48 }
 0x5ee   :  { %v449_v53 = vpop.xlane.xlu0 %448 }
 0x5ef   :  { %v450_v54 = vmul.f32 0.03125, %v449_v53  ;;  %v3229_v53 = vld [vmem:[%s3639_s11 + $0x18] sm:$0xff] }
 0x5f1   :  { %v451_v55 = vadd.f32 1e-05, %v450_v54  ;;  %v3234_v54 = vld [vmem:[%s3639_s11 + $0x10] sm:$0xff] }
 0x5f3   :  { %2789 = vrsqrt.f32 %v451_v55  ;;  %v3241_v55 = vld [vmem:[%s3639_s11 + $0x8] sm:$0xff] }
 0x600   :  { %v2790_v59 = vpop.eup %2789 }
 0x601   :  { %v453_v60 = vmul.f32 %v2790_v59, %v445_v46  ;;  %v3248_v59 = vld [vmem:[%s3639_s11] sm:$0xff] }
 0x603   :  { %v458_v62 = vmul.f32 %v3140_v58, %v453_v60 }
 0x605   :  { %v463_v63 = vadd.f32 %v3144_v61, %v458_v62 }
 0x607   :  { %2591 = vmatmul.mubr.msk.f32.vlgmr.msra.gmra.mxu1 %vm119_vm1, %v463_v63 }
 0x608   :  { %2620 = vmatprep.mubr.msk.f32.mxu1 %vm2886_vm0, %v2885_v0  ;;  %2613 = vmatpush3.msra.mxu1 %v3229_v53 }
 0x609   :  { %2614 = vmatprep.subr.mxu1 %v2885_v0 }
 0x60a   :  { %2615 = vmatpush3.msra.mxu1 %v3234_v54 }
 0x60b   :  { %2616 = vmatprep.subr.mxu1 %v2885_v0 }
 0x60c   :  { %2617 = vmatpush3.msra.mxu1 %v3241_v55 }
 0x60d   :  { %2618 = vmatprep.subr.mxu1 %v2885_v0 }
 0x60e   :  { %2619 = vmatpush3.msra.mxu1 %v3248_v59 }
 0x60f   :  { %2623 = vmatprep.subr.mxu1 %v2885_v0 }
 0x6c7   :  { %v539_v19 = vpop.f32.mrf.mxu1 }
 0x6c8   :  { %v540_v20 = vadd.f32 %v3210_v18, %v539_v19  ;;  %v3255_v19 = vsub.s32 4, %v3044_v14 }
 0x6c9   :  { %v2592_v21 = vpop.f32.mrf.mxu1 }
 0x6ca   :  { %v543_v22 = vmul.f32 %v540_v20, %v540_v20  ;;  %v3262_v21 = vrot.slane %v3094_v37, %v3255_v19 }
 0x6cc   :  { %v544_v23 = vmul.f32 %v543_v22, %v540_v20 }
 0x6ce   :  { %v545_v24 = vmul.f32 0.044715, %v544_v23 }
 0x6d0   :  { %v546_v25 = vadd.f32 %v545_v24, %v540_v20 }
 0x6d2   :  { %v547_v26 = vmul.f32 0.7978846, %v546_v25 }
 0x6d4   :  { %2791 = vtanh.f32 %v547_v26 }
 0x6e1   :  { %v2792_v30 = vpop.eup %2791 }
 0x6e2   :  { %v549_v31 = vadd.f32 1.0, %v2792_v30 }
 0x6e4   :  { %v550_v32 = vmul.f32 0.5, %v549_v31  ;;  %v3273_v31 = vld [vmem:[%s3642_s14] sm:$0x1f] }
 0x6e6   :  { %v551_v33 = vmul.f32 %v550_v32, %v540_v20  ;;  %v3258_v20 = vsub.s32 5, %v3044_v14 }
 0x6e8   :  { %2610 = vmatmul.mubr.msk.f32.vlgmr.msra.gmra.mxu0 %vm556_vm3, %v551_v33  ;;  %v3266_v24 = vrot.slane %v3094_v37, %v3258_v20  ;;  %v3283_v37 = vld [vmem:[%s3631_s3] sm:$0xff]  ;;  %v3298_v33 = vld [vmem:[%s3647_s20 + $0x8] sm:$0xff] }
 0x6e9   :  { %2641 = vmatprep.mubr.msk.f32.mxu0 %vm2886_vm0, %v2885_v0 }
 0x7a8   :  { %v626_v39 = vpop.f32.mrf.mxu0 }
 0x7a9   :  { %v627_v40 = vadd.f32 %v626_v39, %v3221_v36 }
 0x7aa   :  { %v2611_v41 = vpop.f32.mrf.mxu0 }
 0x7ab   :  { %v630_v42 = vadd.f32 %v627_v40, %v463_v63 }
 0x7ad   :  { %v631_v43 = vsel %vm119_vm1, %v630_v42, 0.0 }
 0x7ae   :  { %632 = vadd.xlane.f32.xlu0 %v631_v43 }
 0x837   :  { %v633_v44 = vpop.xlane.xlu0 %632 }
 0x838   :  { %v634_v45 = vmul.f32 0.03125, %v633_v44 }
 0x83a   :  { %v635_v46 = vsub.f32 %v630_v42, %v634_v45 }
 0x83c   :  { %v636_v47 = vmul.f32 %v635_v46, %v635_v46 }
 0x83e   :  { %v637_v48 = vsel %vm119_vm1, %v636_v47, 0.0 }
 0x83f   :  { %638 = vadd.xlane.f32.xlu0 %v637_v48 }
 0x8c8   :  { %v639_v60 = vpop.xlane.xlu0 %638 }
 0x8c9   :  { %v640_v62 = vmul.f32 0.03125, %v639_v60 }
 0x8cb   :  { %v641_v63 = vadd.f32 1e-05, %v640_v62 }
 0x8cd   :  { %2793 = vrsqrt.f32 %v641_v63 }
 0x8da   :  { %v2794_v22 = vpop.eup %2793 }
 0x8db   :  { %v643_v23 = vmul.f32 %v2794_v22, %v635_v46 }
 0x8dd   :  { %v648_v25 = vmul.f32 %v3262_v21, %v643_v23 }
 0x8df   :  { %v653_v26 = vadd.f32 %v3266_v24, %v648_v25 }
 0x8e1   :  { %vm654_vm4 = vcmp.ge.f32.partialorder %v653_v26, 0.0  ;;  %v655_v30 = vmul.f32 0.01, %v653_v26 }
 0x8e3   :  { %v656_v32 = vsel %vm654_vm4, %v653_v26, %v655_v30 }
 0x8e4   :  { %2621 = vmatmul.mubr.msk.f32.vlgmr.msra.gmra.mxu1 %vm119_vm1, %v656_v32 }
 0x8e5   :  { %2624 = vmatpush3.msk.msra.mxu1 %vm759_vm5, %v3273_v31  ;;  %2625 = vmatprep.mubr.msk.f32.mxu1 %vm2886_vm0, %v2885_v0 }
 0x8e6   :  { %2628 = vmatprep.subr.mxu1 %v2885_v0 }
 0x8e8   :  { %2626 = vmatmul.mubr.msk.f32.vlgmr.msra.gmra.mxu1 %vm734_vm6, %v3283_v37 }
 0x8e9   :  { %2629 = vmatpush3.msra.mxu1 %v2995_v1  ;;  %2636 = vmatprep.mubr.msk.f32.mxu1 %vm2886_vm0, %v2885_v0  ;;  %v3318_v1 = vld [vmem:[%s3641_s13] sm:$0x7] }
 0x8ea   :  { %2630 = vmatprep.subr.mxu1 %v2885_v0 }
 0x8eb   :  { %2631 = vmatpush3.msra.mxu1 %v3000_v2  ;;  %v3322_v2 = vrot.slane %v3318_v1, %v3049_v16 }
 0x8ec   :  { %2632 = vmatprep.subr.mxu1 %v2885_v0 }
 0x8ed   :  { %2633 = vmatpush3.msra.mxu1 %v3007_v3 }
 0x8ee   :  { %2634 = vmatprep.subr.mxu1 %v2885_v0 }
 0x8ef   :  { %2635 = vmatpush3.msra.mxu1 %v3014_v4  ;;  %v2166_v4 = vsub.s32 6, %v3044_v14 }
 0x8f0   :  { %2637 = vmatmul.mubr.msk.f32.vlgmr.msra.gmra.mxu1 %vm119_vm1, %v3298_v33  ;;  %2649 = vmatprep.subr.mxu1 %v2885_v0 }
 0x8f1   :  { %2650 = vmatpush3.msra.mxu1 %v3059_v27  ;;  %2657 = vmatprep.mubr.msk.f32.mxu1 %vm2886_vm0, %v2885_v0  ;;  %v2272_v27 = vsub.s32 7, %v3044_v14 }
 0x8f2   :  { %2651 = vmatprep.subr.mxu1 %v2885_v0 }
 0x8f3   :  { %2652 = vmatpush3.msra.mxu1 %v3064_v28 }
 0x8f4   :  { %2653 = vmatprep.subr.mxu1 %v2885_v0 }
 0x8f5   :  { %2654 = vmatpush3.msra.mxu1 %v3071_v29 }
 0x8f6   :  { %2655 = vmatprep.subr.mxu1 %v2885_v0 }
 0x8f7   :  { %2656 = vmatpush3.msra.mxu1 %v3084_v34  ;;  %v3331_v34 = vsel %vm1606_vm7, 1.0, %v2885_v0 }
 0x8f8   :  { %2671 = vmatprep.subr.mxu1 %v2885_v0 }
 0x9a4   :  { %v730_v3 = vpop.f32.mrf.mxu1 }
 0x9a5   :  { %v3328_v28 = vadd.f32 %v730_v3, %v3322_v2 }
 0x9a6   :  { %v2622_v29 = vpop.f32.mrf.mxu1 }
 0x9a7   :  { %735 = vst.msk [vmem:[%s3643_s15] sm:$0xff] %vm734_vm6, %v3328_v28  ;;  %v1631_v39 = vrot.slane %v3328_v28, %v3133_v56  ;;  %v1743_v40 = vrot.slane %v3328_v28, %v3136_v57  ;;  %v1849_v41 = vrot.slane %v3328_v28, %v3217_v35  ;;  %v1955_v43 = vrot.slane %v3328_v28, %v3255_v19 }
 0x9a8   :  { %v3344_v42 = vpop.f32.mrf.mxu1  ;;  %v2061_v44 = vrot.slane %v3328_v28, %v3258_v20  ;;  %v2167_v45 = vrot.slane %v3328_v28, %v2166_v4  ;;  %v2273_v46 = vrot.slane %v3328_v28, %v2272_v27  ;;  %v950_v29 = vrot.slane %v3046_v15, %v3133_v56 }
 0x9a9   :  { %v3357_v47 = vmul.f32 %v3331_v34, %v1631_v39  ;;  %v3360_v60 = vmul.f32 %v3331_v34, %v1743_v40  ;;  %v3363_v62 = vmul.f32 %v3331_v34, %v1849_v41  ;;  %v3366_v63 = vmul.f32 %v3331_v34, %v1955_v43 }
 0x9aa   :  { %v2627_v48 = vpop.f32.mrf.mxu1  ;;  %v3369_v22 = vmul.f32 %v3331_v34, %v2061_v44  ;;  %v3372_v23 = vmul.f32 %v3331_v34, %v2167_v45  ;;  %v3375_v25 = vmul.f32 %v3331_v34, %v2273_v46 }
 0x9b0   :  { %v943_v26 = vpop.f32.mrf.mxu1 }
 0x9b1   :  { %v944_v30 = vadd.f32 %v3032_v6, %v943_v26 }
 0x9b2   :  { %v2638_v32 = vpop.f32.mrf.mxu1 }
 0x9b3   :  { %952 = vrot.lane.b32.xlu0 %v944_v30, %s2887_s22 }
 0xa25   :  { %v953_v3 = vpop.permute.xlu0 %952 }
 0xa26   :  { %2640 = vmatpush3.xpose.msk.msra.mxu0 %vm119_vm1, %v953_v3 }
 0xa27   :  { %2644 = vmatprep.subr.mxu0 %v2885_v0 }
 0xa29   :  { %2642 = vmatmul.mubr.msk.f32.vlgmr.msra.gmra.mxu0 %vm119_vm1, %v944_v30 }
 0xa2a   :  { %2646 = vmatprep.mubr.msk.f32.mxu0 %vm2886_vm0, %v2885_v0 }
 0xae9   :  { %v1024_v39 = vpop.f32.mrf.mxu0 }
 0xaea   :  { %v1025_v40 = vadd.f32 %v1024_v39, %v950_v29 }
 0xaeb   :  { %v2643_v41 = vpop.f32.mrf.mxu0 }
 0xaec   :  { %v1028_v6 = vsel %vm274_vm2, %v1025_v40, -inf }
 0xaed   :  { %1029 = vmax.xlane.f32.xlu1 %v1028_v6 }
 0xb76   :  { %v1030_v43 = vpop.xlane.xlu1 %1029 }
 0xb77   :  { %v1031_v44 = vsub.f32 %v1025_v40, %v1030_v43 }
 0xb79   :  { %v1032_v45 = vmul.f32 1.442695, %v1031_v44 }
 0xb7b   :  { %2795 = vpow2.f32 %v1032_v45 }
 0xb88   :  { %v2796_v46 = vpop.eup %2795 }
 0xb89   :  { %v1034_v48 = vsel %vm274_vm2, %v2796_v46, 0.0 }
 0xb8a   :  { %1035 = vadd.xlane.f32.xlu1 %v1034_v48 }
 0xb9b   :  { %1039 = vrot.lane.b32.xlu1 %v944_v30, %s2888_s6 }
 0xc13   :  { %v1036_v26 = vpop.xlane.xlu1 %1035 }
 0xc14   :  { %2797 = vrcp.f32 %v1036_v26 }
 0xc17   :  { %v1040_v32 = vpop.permute.xlu1 %1039 }
 0xc18   :  { %2645 = vmatpush3.msra.mxu0 %v1040_v32 }
 0xc19   :  { %2660 = vmatprep.subr.mxu0 %v2885_v0 }
 0xc21   :  { %v2798_v15 = vpop.eup %2797 }
 0xc22   :  { %v1038_v3 = vmul.f32 %v2798_v15, %v2796_v46 }
 0xc24   :  { %2647 = vmatmul.mubr.msk.f32.vlgmr.msra.gmra.mxu0 %vm274_vm2, %v1038_v3 }
 0xc25   :  { %2661 = vmatpush3.msra.mxu0 %v3107_v49  ;;  %2668 = vmatprep.mubr.msk.f32.mxu0 %vm2886_vm0, %v2885_v0 }
 0xc26   :  { %2662 = vmatprep.subr.mxu0 %v2885_v0 }
 0xc27   :  { %2663 = vmatpush3.msra.mxu0 %v3114_v50 }
 0xc28   :  { %2664 = vmatprep.subr.mxu0 %v2885_v0 }
 0xc29   :  { %2665 = vmatpush3.msra.mxu0 %v3119_v51 }
 0xc2a   :  { %2666 = vmatprep.subr.mxu0 %v2885_v0 }
 0xc2b   :  { %2667 = vmatpush3.msra.mxu0 %v3126_v52 }
 0xc2c   :  { %2690 = vmatprep.subr.mxu0 %v2885_v0 }
 0xce4   :  { %v1111_v30 = vpop.f32.mrf.mxu0 }
 0xce5   :  { %2658 = vmatmul.mubr.msk.f32.vlgmr.msra.gmra.mxu1 %vm119_vm1, %v1111_v30 }
 0xce6   :  { %v2648_v49 = vpop.f32.mrf.mxu0  ;;  %2672 = vmatpush3.msra.mxu1 %v3154_v5  ;;  %2687 = vmatprep.mubr.msk.f32.mxu1 %vm2886_vm0, %v2885_v0 }
 0xce7   :  { %2673 = vmatprep.subr.mxu1 %v2885_v0 }
 0xce8   :  { %2674 = vmatpush3.msra.mxu1 %v3161_v7 }
 0xce9   :  { %2675 = vmatprep.subr.mxu1 %v2885_v0 }
 0xcea   :  { %2676 = vmatpush3.msra.mxu1 %v3168_v8 }
 0xceb   :  { %2677 = vmatprep.subr.mxu1 %v2885_v0 }
 0xcec   :  { %2678 = vmatpush3.msra.mxu1 %v3175_v9 }
 0xced   :  { %2679 = vmatprep.subr.mxu1 %v2885_v0 }
 0xcee   :  { %2680 = vmatpush3.msra.mxu1 %v3182_v10 }
 0xcef   :  { %2681 = vmatprep.subr.mxu1 %v2885_v0 }
 0xcf0   :  { %2682 = vmatpush3.msra.mxu1 %v3189_v11 }
 0xcf1   :  { %2683 = vmatprep.subr.mxu1 %v2885_v0 }
 0xcf2   :  { %2684 = vmatpush3.msra.mxu1 %v3196_v13 }
 0xcf3   :  { %2685 = vmatprep.subr.mxu1 %v2885_v0 }
 0xcf4   :  { %2686 = vmatpush3.msra.mxu1 %v3203_v17 }
 0xcf5   :  { %2711 = vmatprep.subr.mxu1 %v2885_v0 }
 0xda5   :  { %v1184_v50 = vpop.f32.mrf.mxu1 }
 0xda6   :  { %v1185_v51 = vadd.f32 %v1184_v50, %v3098_v38 }
 0xda7   :  { %v2659_v52 = vpop.f32.mrf.mxu1 }
 0xda8   :  { %v1188_v5 = vadd.f32 %v3298_v33, %v1185_v51 }
 0xdaa   :  { %v1189_v7 = vsel %vm119_vm1, %v1188_v5, 0.0 }
 0xdab   :  { %1190 = vadd.xlane.f32.xlu0 %v1189_v7  ;;  %v2889_v7 = vmov 1  }
 0xdac   :  { %2774 = vset.pattern.permute.xlu1 %v2889_v7  ;;  %2773 = vset.pattern.permute.xlu0 %v2889_v7 }
 0xe34   :  { %v1191_v8 = vpop.xlane.xlu0 %1190 }
 0xe35   :  { %v1192_v9 = vmul.f32 0.03125, %v1191_v8 }
 0xe37   :  { %v1193_v10 = vsub.f32 %v1188_v5, %v1192_v9  ;;  %v3445_v5 = vsub.f32 1.0, %v3041_v12 }
 0xe39   :  { %v1194_v11 = vmul.f32 %v1193_v10, %v1193_v10 }
 0xe3b   :  { %v1195_v13 = vsel %vm119_vm1, %v1194_v11, 0.0 }
 0xe3c   :  { %1196 = vadd.xlane.f32.xlu1 %v1195_v13 }
 0xe4d   :  { %1735 = vperm.xlu1 %2774, %v3445_v5  }
 0xec5   :  { %v1197_v29 = vpop.xlane.xlu1 %1196 }
 0xec6   :  { %v1198_v17 = vmul.f32 0.03125, %v1197_v29 }
 0xec8   :  { %v1199_v39 = vadd.f32 1e-05, %v1198_v17 }
 0xeca   :  { %2799 = vrsqrt.f32 %v1199_v39 }
 0xed7   :  { %v2800_v40 = vpop.eup %2799 }
 0xed8   :  { %v1201_v41 = vmul.f32 %v2800_v40, %v1193_v10 }
 0xeda   :  { %v1202_v38 = vmul.f32 %v1201_v41, %v3140_v58  ;;  %v3460_v41 = vld [vmem:[%s3631_s3 + $0x8] sm:$0xff] }
 0xedc   :  { %v1203_v33 = vadd.f32 %v1202_v38, %v3144_v61 }
 0xede   :  { %2669 = vmatmul.mubr.msk.f32.vlgmr.msra.gmra.mxu0 %vm119_vm1, %v1203_v33 }
 0xedf   :  { %2691 = vmatpush3.msra.mxu0 %v3229_v53  ;;  %2698 = vmatprep.mubr.msk.f32.mxu0 %vm2886_vm0, %v2885_v0 }
 0xee0   :  { %2692 = vmatprep.subr.mxu0 %v2885_v0 }
 0xee1   :  { %2693 = vmatpush3.msra.mxu0 %v3234_v54 }
 0xee2   :  { %2694 = vmatprep.subr.mxu0 %v2885_v0 }
 0xee3   :  { %2695 = vmatpush3.msra.mxu0 %v3241_v55 }
 0xee4   :  { %2696 = vmatprep.subr.mxu0 %v2885_v0 }
 0xee5   :  { %2697 = vmatpush3.msra.mxu0 %v3248_v59 }
 0xee6   :  { %2701 = vmatprep.subr.mxu0 %v2885_v0 }
 0xf9e   :  { %v1273_v58 = vpop.f32.mrf.mxu0 }
 0xf9f   :  { %v1274_v61 = vadd.f32 %v3210_v18, %v1273_v58 }
 0xfa0   :  { %v2670_v53 = vpop.f32.mrf.mxu0 }
 0xfa1   :  { %v1277_v6 = vmul.f32 %v1274_v61, %v1274_v61 }
 0xfa3   :  { %v1278_v43 = vmul.f32 %v1277_v6, %v1274_v61 }
 0xfa5   :  { %v1279_v44 = vmul.f32 0.044715, %v1278_v43 }
 0xfa7   :  { %v1280_v45 = vadd.f32 %v1279_v44, %v1274_v61 }
 0xfa9   :  { %v1281_v46 = vmul.f32 0.7978846, %v1280_v45 }
 0xfab   :  { %2801 = vtanh.f32 %v1281_v46  ;;  %v1615_v46 = vrot.slane %v3328_v28, %v3049_v16 }
 0xfb8   :  { %v2802_v54 = vpop.eup %2801 }
 0xfb9   :  { %v1283_v48 = vadd.f32 1.0, %v2802_v54 }
 0xfbb   :  { %v1284_v26 = vmul.f32 0.5, %v1283_v48 }
 0xfbd   :  { %v1285_v55 = vmul.f32 %v1284_v26, %v1274_v61  ;;  %v2451_v26 = vsel %vm1609_vm10, 1.0, %v2885_v0 }
 0xfbf   :  { %2688 = vmatmul.mubr.msk.f32.vlgmr.msra.gmra.mxu1 %vm556_vm3, %v1285_v55  ;;  %v1616_v55 = vmul.f32 %v3331_v34, %v1615_v46 }
 0xfc0   :  { %2713 = vmatprep.mubr.msk.f32.mxu1 %vm2886_vm0, %v2885_v0 }
0x107f   :  { %v1355_v59 = vpop.f32.mrf.mxu1 }
0x1080   :  { %v1356_v32 = vadd.f32 %v1355_v59, %v3221_v36  ;;  %v98_v36 = vsel %vm97_vm8, %v3273_v31, -inf  ;;  %v1626_v59 = vrot.slane %v3318_v1, %v3133_v56 }
0x1081   :  { %v2689_v18 = vpop.f32.mrf.mxu1 }
0x1082   :  { %v1359_v15 = vadd.f32 %v1356_v32, %v1203_v33 }
0x1084   :  { %v1360_v3 = vsel %vm119_vm1, %v1359_v15, 0.0 }
0x1085   :  { %1361 = vadd.xlane.f32.xlu0 %v1360_v3 }
0x110e   :  { %v1362_v30 = vpop.xlane.xlu0 %1361 }
0x110f   :  { %v1363_v49 = vmul.f32 0.03125, %v1362_v30 }
0x1111   :  { %v1364_v50 = vsub.f32 %v1359_v15, %v1363_v49 }
0x1113   :  { %v1365_v51 = vmul.f32 %v1364_v50, %v1364_v50 }
0x1115   :  { %v1366_v52 = vsel %vm119_vm1, %v1365_v51, 0.0 }
0x1116   :  { %1367 = vadd.xlane.f32.xlu0 %v1366_v52 }
0x111a   :  { %99 = vmax.xlane.f32.xlu0 %v98_v36 }
0x119f   :  { %v1368_v8 = vpop.xlane.xlu0 %1367 }
0x11a0   :  { %v1369_v9 = vmul.f32 0.03125, %v1368_v8 }
0x11a2   :  { %v1370_v10 = vadd.f32 1e-05, %v1369_v9 }
0x11a4   :  { %2803 = vrsqrt.f32 %v1370_v10 }
0x11b1   :  { %v2804_v11 = vpop.eup %2803 }
0x11b2   :  { %v1372_v13 = vmul.f32 %v2804_v11, %v1364_v50 }
0x11b4   :  { %v1373_v29 = vmul.f32 %v1372_v13, %v3262_v21  ;;  %v100_v21 = vpop.xlane.xlu0 %99 }
0x11b6   :  { %v1374_v17 = vadd.f32 %v1373_v29, %v3266_v24  ;;  %v101_v24 = vrot.slane %v100_v21, 4 }
0x11b8   :  { %vm1375_vm9 = vcmp.ge.f32.partialorder %v1374_v17, 0.0  ;;  %v1376_v39 = vmul.f32 0.01, %v1374_v17  ;;  %v102_v38 = vmax.f32 %v100_v21, %v101_v24 }
0x11ba   :  { %v1377_v40 = vsel %vm1375_vm9, %v1374_v17, %v1376_v39  ;;  %v103_v33 = vrot.slane %v102_v38, 2 }
0x11bb   :  { %2699 = vmatmul.mubr.msk.f32.vlgmr.msra.gmra.mxu0 %vm119_vm1, %v1377_v40 }
0x11bc   :  { %2702 = vmatpush3.msk.msra.mxu0 %vm759_vm5, %v3273_v31  ;;  %2703 = vmatprep.mubr.msk.f32.mxu0 %vm2886_vm0, %v2885_v0  ;;  %v104_v58 = vmax.f32 %v102_v38, %v103_v33  ;;  %v1736_v38 = vpop.permute.xlu1 %1735 }
0x11bd   :  { %2706 = vmatprep.subr.mxu0 %v2885_v0 }
0x11be   :  { %v105_v61 = vrot.slane %v104_v58, 1 }
0x11bf   :  { %2704 = vmatmul.mubr.msk.f32.vlgmr.msra.gmra.mxu0 %vm734_vm6, %v3460_v41 }
0x11c0   :  { %2708 = vmatprep.mubr.msk.f32.mxu0 %vm2886_vm0, %v2885_v0  ;;  %v106_v53 = vmax.f32 %v104_v58, %v105_v61 }
0x11c2   :  { %2741 = vpush %v106_v53 }
0x11f3   :  { %s2742_s17 = spop %2741 }
0x11f4   :  { %v3466_v6 = vstv %s2742_s17 }
0x11f5   :  { %v109_v43 = vsub.f32 %v3273_v31, %v3466_v6 }
0x11f7   :  { %v110_v44 = vmul.f32 1.442695, %v109_v43 }
0x11f9   :  { %2805 = vpow2.f32 %v110_v44 }
0x1206   :  { %v3470_v45 = vpop.eup %2805 }
0x1207   :  { %2707 = vmatpush3.msk.msra.mxu0 %vm759_vm5, %v3470_v45  ;;  %2712 = vmatpush3.msk.msra.mxu1 %vm759_vm5, %v3470_v45 }
0x1208   :  { %2716 = vmatprep.subr.mxu0 %v2885_v0  ;;  %2721 = vmatprep.subr.mxu1 %v2885_v0 }
0x127b   :  { %v1447_v31 = vpop.f32.mrf.mxu0 }
0x127c   :  { %v3482_v54 = vadd.f32 %v1447_v31, %v3322_v2 }
0x127d   :  { %v2700_v48 = vpop.f32.mrf.mxu0 }
0x127e   :  { %2445 = vst.msk [vmem:[%s3643_s15 + $0x8] sm:$0xff] %vm734_vm6, %v3482_v54  ;;  %v1620_v32 = vrot.slane %v3482_v54, %v3049_v16  ;;  %v1636_v2 = vrot.slane %v3482_v54, %v3133_v56  ;;  %v1748_v18 = vrot.slane %v3482_v54, %v3136_v57  ;;  %v1854_v34 = vrot.slane %v3482_v54, %v3217_v35 }
0x127f   :  { %v1960_v15 = vrot.slane %v3482_v54, %v3255_v19  ;;  %v2066_v3 = vrot.slane %v3482_v54, %v3258_v20  ;;  %v2172_v30 = vrot.slane %v3482_v54, %v2166_v4  ;;  %v2278_v16 = vrot.slane %v3482_v54, %v2272_v27 }
0x1280   :  { %v1621_v56 = vmul.f32 %v2451_v26, %v1620_v32  ;;  %v1637_v49 = vmul.f32 %v2451_v26, %v1636_v2  ;;  %v1749_v50 = vmul.f32 %v2451_v26, %v1748_v18  ;;  %v1855_v51 = vmul.f32 %v2451_v26, %v1854_v34 }
0x1281   :  { %v1961_v52 = vmul.f32 %v2451_v26, %v1960_v15  ;;  %v2067_v35 = vmul.f32 %v2451_v26, %v2066_v3  ;;  %v2173_v7 = vmul.f32 %v2451_v26, %v2172_v30  ;;  %v2279_v36 = vmul.f32 %v2451_v26, %v2278_v16 }
0x1282   :  { %v1622_v19 = vadd.f32 %v1621_v56, %v1616_v55  ;;  %v1638_v8 = vadd.f32 %v1637_v49, %v3357_v47  ;;  %v1750_v20 = vadd.f32 %v1749_v50, %v3360_v60  ;;  %v3514_v9 = vadd.f32 %v1855_v51, %v3363_v62  ;;  %v3532_v62 = vpop.f32.mrf.mxu0 }
0x1283   :  { %v3517_v14 = vadd.f32 %v1961_v52, %v3366_v63  ;;  %v3520_v4 = vadd.f32 %v2067_v35, %v3369_v22  ;;  %v3523_v27 = vadd.f32 %v2173_v7, %v3372_v23  ;;  %v3526_v10 = vadd.f32 %v2279_v36, %v3375_v25 }
0x1284   :  { %v1627_v11 = vadd.f32 %v1626_v59, %v1622_v19  ;;  %v2890_v60 = vmov 2   ;;  %v2705_v63 = vpop.f32.mrf.mxu0  ;;  %v2891_v55 = vmov 3   ;;  %v2892_v52 = vmov 4  }
0x1285   :  { %2777 = vset.pattern.permute.xlu1 %v2891_v55 }
0x1286   :  { %v1639_v47 = vsel %vm1591_vm11, %v1627_v11, -inf  ;;  %v1738_v61 = vmul.f32 %v1736_v38, %v1627_v11  ;;  %v2839_v38 = vld [vmem:[#allocation2] sm:$0x3] }
0x1287   :  { %1640 = vmax.xlane.f32.xlu0 %v1639_v47 }
0x129d   :  { %1728 = vperm.xlu0 %2773, %v3041_v12  }
0x12a1   :  { %2775 = vset.pattern.permute.xlu0 %v2890_v60 }
0x12a2   :  { %1836 = vperm.xlu0 %2775, %v3041_v12  }
0x12a6   :  { %1841 = vperm.xlu0 %2775, %v3445_v5  }
0x12aa   :  { %2776 = vset.pattern.permute.xlu0 %v2891_v55 }
0x12ab   :  { %1942 = vperm.xlu0 %2776, %v3041_v12  }
0x1310   :  { %v1641_v22 = vpop.xlane.xlu0 %1640 }
0x1311   :  { %v1642_v23 = vsub.f32 %v1627_v11, %v1641_v22  ;;  %v1721_v40 = vadd.f32 %v1641_v22, %v3466_v6 }
0x1313   :  { %v1643_v13 = vmul.f32 1.442695, %v1642_v23 }
0x1315   :  { %2807 = vpow2.f32 %v1643_v13 }
0x1318   :  { %v1729_v58 = vpop.permute.xlu0 %1728 }
0x131d   :  { %v1837_v2 = vpop.permute.xlu0 %1836 }
0x1321   :  { %v1842_v30 = vpop.permute.xlu0 %1841 }
0x1322   :  { %v2808_v25 = vpop.eup %2807 }
0x1323   :  { %2709 = vmatmul.mubr.msk.f32.vlgmr.msra.gmra.mxu0 %vm734_vm6, %v2808_v25 }
0x1324   :  { %2717 = vmatpush3.msk.msra.mxu0 %vm759_vm5, %v3470_v45  ;;  %2718 = vmatprep.mubr.msk.f32.mxu0 %vm2886_vm0, %v2885_v0 }
0x1325   :  { %2726 = vmatprep.subr.mxu0 %v2885_v0 }
0x1326   :  { %v1943_v22 = vpop.permute.xlu0 %1942 }
0x13e3   :  { %v1717_v29 = vpop.f32.mrf.mxu0 }
0x13e4   :  { %2809 = vlog2.f32 %v1717_v29 }
0x13e5   :  { %v2710_v17 = vpop.f32.mrf.mxu0 }
0x13f1   :  { %v2810_v39 = vpop.eup %2809 }
0x13f2   :  { %v1723_v21 = vmul.f32 0.6931472, %v2810_v39 }
0x13f4   :  { %v1724_v24 = vadd.f32 %v1723_v21, %v1721_v40 }
0x13f6   :  { %v1725_v33 = vadd.f32 %v1724_v24, %v1638_v8 }
0x13f8   :  { %v1731_v53 = vmul.f32 %v1729_v58, %v1725_v33 }
0x13fa   :  { %v1739_v43 = vadd.f32 %v1738_v61, %v1731_v53 }
0x13fc   :  { %v1751_v44 = vsel %vm1591_vm11, %v1739_v43, -inf  ;;  %v1844_v56 = vmul.f32 %v1842_v30, %v1739_v43 }
0x13fd   :  { %1752 = vmax.xlane.f32.xlu1 %v1751_v44 }
0x1486   :  { %v1753_v46 = vpop.xlane.xlu1 %1752 }
0x1487   :  { %v1754_v31 = vsub.f32 %v1739_v43, %v1753_v46  ;;  %v1830_v34 = vadd.f32 %v1753_v46, %v3466_v6 }
0x1489   :  { %v1755_v48 = vmul.f32 1.442695, %v1754_v31 }
0x148b   :  { %2811 = vpow2.f32 %v1755_v48 }
0x1498   :  { %v2812_v26 = vpop.eup %2811 }
0x1499   :  { %2714 = vmatmul.mubr.msk.f32.vlgmr.msra.gmra.mxu1 %vm734_vm6, %v2812_v26 }
0x149a   :  { %2722 = vmatpush3.msk.msra.mxu1 %vm759_vm5, %v3470_v45  ;;  %2723 = vmatprep.mubr.msk.f32.mxu1 %vm2886_vm0, %v2885_v0 }
0x149b   :  { %2731 = vmatprep.subr.mxu1 %v2885_v0 }
0x1559   :  { %v1826_v59 = vpop.f32.mrf.mxu1 }
0x155a   :  { %2813 = vlog2.f32 %v1826_v59 }
0x155b   :  { %v2715_v32 = vpop.f32.mrf.mxu1 }
0x1567   :  { %v2814_v18 = vpop.eup %2813 }
0x1568   :  { %v1832_v15 = vmul.f32 0.6931472, %v2814_v18 }
0x156a   :  { %v1833_v3 = vadd.f32 %v1832_v15, %v1830_v34 }
0x156c   :  { %v1834_v16 = vadd.f32 %v1833_v3, %v1750_v20 }
0x156e   :  { %v1839_v49 = vmul.f32 %v1837_v2, %v1834_v16  ;;  %v2894_v2 = vmov 6  }
0x1570   :  { %v1845_v50 = vadd.f32 %v1844_v56, %v1839_v49 }
0x1572   :  { %v1857_v51 = vsel %vm1591_vm11, %v1845_v50, -inf }
0x1573   :  { %1858 = vmax.xlane.f32.xlu1 %v1857_v51 }
0x1584   :  { %1947 = vperm.xlu1 %2777, %v3445_v5  }
0x1588   :  { %2778 = vset.pattern.permute.xlu1 %v2892_v52 }
0x1589   :  { %2048 = vperm.xlu1 %2778, %v3041_v12  }
0x158d   :  { %2053 = vperm.xlu1 %2778, %v3445_v5  }
0x15fc   :  { %v1859_v35 = vpop.xlane.xlu1 %1858 }
0x15fd   :  { %v1860_v7 = vsub.f32 %v1845_v50, %v1859_v35  ;;  %v1936_v11 = vadd.f32 %v1859_v35, %v3466_v6 }
0x15ff   :  { %v1861_v36 = vmul.f32 1.442695, %v1860_v7 }
0x1600   :  { %v1948_v63 = vpop.permute.xlu1 %1947 }
0x1601   :  { %2815 = vpow2.f32 %v1861_v36  ;;  %v1950_v13 = vmul.f32 %v1948_v63, %v1845_v50 }
0x1604   :  { %v2049_v61 = vpop.permute.xlu1 %2048 }
0x1608   :  { %v2054_v31 = vpop.permute.xlu1 %2053 }
0x160e   :  { %v2816_v19 = vpop.eup %2815 }
0x160f   :  { %2719 = vmatmul.mubr.msk.f32.vlgmr.msra.gmra.mxu0 %vm734_vm6, %v2816_v19 }
0x1610   :  { %2727 = vmatpush3.msk.msra.mxu0 %vm759_vm5, %v3470_v45  ;;  %2728 = vmatprep.mubr.msk.f32.mxu0 %vm2886_vm0, %v2885_v0 }
0x1611   :  { %2736 = vmatprep.subr.mxu0 %v2885_v0 }
0x16cf   :  { %v1932_v8 = vpop.f32.mrf.mxu0 }
0x16d0   :  { %2817 = vlog2.f32 %v1932_v8 }
0x16d1   :  { %v2720_v12 = vpop.f32.mrf.mxu0 }
0x16dd   :  { %v2818_v20 = vpop.eup %2817 }
0x16de   :  { %v1938_v47 = vmul.f32 0.6931472, %v2818_v20 }
0x16e0   :  { %v1939_v60 = vadd.f32 %v1938_v47, %v1936_v11  ;;  %v2895_v11 = vmov 7  }
0x16e2   :  { %v1940_v23 = vadd.f32 %v1939_v60, %v3514_v9  ;;  %v2893_v9 = vmov 5  }
0x16e3   :  { %2780 = vset.pattern.permute.xlu1 %v2893_v9  ;;  %2779 = vset.pattern.permute.xlu0 %v2893_v9 }
0x16e4   :  { %v1945_v25 = vmul.f32 %v1943_v22, %v1940_v23 }
0x16e6   :  { %v1951_v29 = vadd.f32 %v1950_v13, %v1945_v25 }
0x16e8   :  { %v1963_v17 = vsel %vm1591_vm11, %v1951_v29, -inf  ;;  %v2056_v26 = vmul.f32 %v2054_v31, %v1951_v29 }
0x16e9   :  { %1964 = vmax.xlane.f32.xlu0 %v1963_v17 }
0x16ff   :  { %2154 = vperm.xlu0 %2779, %v2839_v38  }
0x1703   :  { %2781 = vset.pattern.permute.xlu0 %v2894_v2 }
0x1704   :  { %2260 = vperm.xlu0 %2781, %v2839_v38  }
0x1708   :  { %2265 = vperm.xlu0 %2781, %v3445_v5  }
0x170c   :  { %2783 = vset.pattern.permute.xlu0 %v2895_v11 }
0x1772   :  { %v1965_v39 = vpop.xlane.xlu0 %1964 }
0x1773   :  { %v1966_v40 = vsub.f32 %v1951_v29, %v1965_v39  ;;  %v2042_v43 = vadd.f32 %v1965_v39, %v3466_v6 }
0x1775   :  { %v1967_v21 = vmul.f32 1.442695, %v1966_v40 }
0x1777   :  { %2819 = vpow2.f32 %v1967_v21 }
0x177a   :  { %v2155_v35 = vpop.permute.xlu0 %2154 }
0x177f   :  { %v2261_v60 = vpop.permute.xlu0 %2260 }
0x1783   :  { %v2266_v25 = vpop.permute.xlu0 %2265 }
0x1784   :  { %v2820_v24 = vpop.eup %2819 }
0x1785   :  { %2724 = vmatmul.mubr.msk.f32.vlgmr.msra.gmra.mxu1 %vm734_vm6, %v2820_v24 }
0x1786   :  { %2732 = vmatpush3.msk.msra.mxu1 %vm759_vm5, %v3470_v45  ;;  %2733 = vmatprep.mubr.msk.f32.mxu1 %vm2886_vm0, %v2885_v0 }
0x1845   :  { %v2038_v33 = vpop.f32.mrf.mxu1 }
0x1846   :  { %2821 = vlog2.f32 %v2038_v33 }
0x1847   :  { %v2725_v58 = vpop.f32.mrf.mxu1 }
0x1848   :  { %v2896_v58 = vmov 0  }
0x1853   :  { %v2822_v53 = vpop.eup %2821 }
0x1854   :  { %v2044_v44 = vmul.f32 0.6931472, %v2822_v53 }
0x1856   :  { %v2045_v46 = vadd.f32 %v2044_v44, %v2042_v43 }
0x1858   :  { %v2046_v48 = vadd.f32 %v2045_v46, %v3517_v14 }
0x185a   :  { %v2051_v55 = vmul.f32 %v2049_v61, %v2046_v48 }
0x185c   :  { %v2057_v59 = vadd.f32 %v2056_v26, %v2051_v55 }
0x185e   :  { %v2069_v32 = vsel %vm1591_vm11, %v2057_v59, -inf }
0x185f   :  { %2070 = vmax.xlane.f32.xlu1 %v2069_v32 }
0x1870   :  { %2159 = vperm.xlu1 %2780, %v3445_v5  }
0x1874   :  { %2782 = vset.pattern.permute.xlu1 %v2895_v11 }
0x18e8   :  { %v2071_v18 = vpop.xlane.xlu1 %2070 }
0x18e9   :  { %v2072_v34 = vsub.f32 %v2057_v59, %v2071_v18  ;;  %v2148_v56 = vadd.f32 %v2071_v18, %v3466_v6 }
0x18eb   :  { %v2073_v15 = vmul.f32 1.442695, %v2072_v34  ;;  %v2447_v34 = vld [vmem:[%s3630_s2 + $0x8] sm:$0xff] }
0x18ec   :  { %v2160_v51 = vpop.permute.xlu1 %2159 }
0x18ed   :  { %2823 = vpow2.f32 %v2073_v15  ;;  %v2162_v7 = vmul.f32 %v2160_v51, %v2057_v59  ;;  %v1589_v59 = vrot.slane %v3318_v1, %v3136_v57 }
0x18fa   :  { %v2824_v3 = vpop.eup %2823 }
0x18fb   :  { %2729 = vmatmul.mubr.msk.f32.vlgmr.msra.gmra.mxu0 %vm734_vm6, %v2824_v3  ;;  %v738_v3 = vmul.f32 %v3283_v37, %v3328_v28 }
0x18fc   :  { %2737 = vmatpush3.msk.msra.mxu0 %vm759_vm5, %v3470_v45  ;;  %2738 = vmatprep.mubr.msk.f32.mxu0 %vm2886_vm0, %v2885_v0 }
0x19bb   :  { %v2144_v14 = vpop.f32.mrf.mxu0 }
0x19bc   :  { %2825 = vlog2.f32 %v2144_v14 }
0x19bd   :  { %v2730_v30 = vpop.f32.mrf.mxu0 }
0x19c9   :  { %v2826_v16 = vpop.eup %2825 }
0x19ca   :  { %v2150_v49 = vmul.f32 0.6931472, %v2826_v16 }
0x19cc   :  { %v2151_v50 = vadd.f32 %v2150_v49, %v2148_v56  ;;  %v833_v56 = vrot.slane %v3283_v37, 1  ;;  %v851_v49 = vrot.slane %v3283_v37, 7  ;;  %v1457_v37 = vmul.f32 %v3460_v41, %v3482_v54  ;;  %v1585_v54 = vld [vmem:[%s3632_s4] sm:$0x3] }
0x19ce   :  { %v2152_v52 = vadd.f32 %v2151_v50, %v3520_v4  ;;  %v835_v51 = vmul.f32 %v833_v56, %v3344_v42 }
0x19d0   :  { %v2157_v36 = vmul.f32 %v2155_v35, %v2152_v52  ;;  %v853_v52 = vmul.f32 %v851_v49, %v3318_v1 }
0x19d2   :  { %v2163_v19 = vadd.f32 %v2162_v7, %v2157_v36  ;;  %v855_v28 = vrot.slane %v853_v52, 1 }
0x19d4   :  { %v2175_v45 = vsel %vm1591_vm11, %v2163_v19, -inf  ;;  %v2268_v17 = vmul.f32 %v2266_v25, %v2163_v19  ;;  %v858_v42 = vsel %vm857_vm13, %v855_v28, 0.0 }
0x19d5   :  { %2176 = vmax.xlane.f32.xlu1 %v2175_v45 }
0x19e6   :  { %2366 = vperm.xlu1 %2782, %v2839_v38  }
0x19ea   :  { %2784 = vset.pattern.permute.xlu1 %v2896_v58 }
0x1a5e   :  { %v2177_v8 = vpop.xlane.xlu1 %2176 }
0x1a5f   :  { %v2178_v0 = vsub.f32 %v2163_v19, %v2177_v8  ;;  %v2254_v22 = vadd.f32 %v2177_v8, %v3466_v6  ;;  %v1548_v8 = vrot.slane %v3460_v41, 1 }
0x1a61   :  { %v2179_v12 = vmul.f32 1.442695, %v2178_v0  ;;  %v1565_v0 = vrot.slane %v3460_v41, 7  ;;  %v1550_v11 = vmul.f32 %v1548_v8, %v3532_v62 }
0x1a62   :  { %v2367_v48 = vpop.permute.xlu1 %2366 }
0x1a63   :  { %2827 = vpow2.f32 %v2179_v12 }
0x1a70   :  { %v2828_v20 = vpop.eup %2827 }
0x1a71   :  { %2734 = vmatmul.mubr.msk.f32.vlgmr.msra.gmra.mxu1 %vm734_vm6, %v2828_v20 }
0x1b31   :  { %v2250_v47 = vpop.f32.mrf.mxu1 }
0x1b32   :  { %2829 = vlog2.f32 %v2250_v47  ;;  %v1567_v47 = vmul.f32 %v1565_v0, %v3318_v1 }
0x1b33   :  { %v2735_v4 = vpop.f32.mrf.mxu1 }
0x1b3f   :  { %v2830_v63 = vpop.eup %2829 }
0x1b40   :  { %v2256_v23 = vmul.f32 0.6931472, %v2830_v63  ;;  %v1569_v63 = vrot.slane %v1567_v47, 1 }
0x1b42   :  { %v2257_v13 = vadd.f32 %v2256_v23, %v2254_v22  ;;  %v1571_v41 = vsel %vm857_vm13, %v1569_v63, 0.0  ;;  %v1590_v23 = vmul.f32 %v1589_v59, %v1585_v54 }
0x1b44   :  { %v2258_v29 = vadd.f32 %v2257_v13, %v3523_v27  ;;  %v1592_v62 = vsel %vm1591_vm11, %v1590_v23, 0.0 }
0x1b46   :  { %v2263_v39 = vmul.f32 %v2261_v60, %v2258_v29 }
0x1b48   :  { %v2269_v40 = vadd.f32 %v2268_v17, %v2263_v39 }
0x1b4a   :  { %v2281_v21 = vsel %vm1591_vm11, %v2269_v40, -inf }
0x1b4b   :  { %2282 = vmax.xlane.f32.xlu0 %v2281_v21 }
0x1b61   :  { %2371 = vperm.xlu0 %2783, %v3445_v5  }
0x1bd4   :  { %v2283_v24 = vpop.xlane.xlu0 %2282 }
0x1bd5   :  { %v2284_v9 = vsub.f32 %v2269_v40, %v2283_v24  ;;  %v2360_v43 = vadd.f32 %v2283_v24, %v3466_v6  ;;  %v737_v6 = vld [vmem:[%s3630_s2] sm:$0xff] }
0x1bd7   :  { %v2285_v38 = vmul.f32 1.442695, %v2284_v9 }
0x1bd9   :  { %2831 = vpow2.f32 %v2285_v38 }
0x1bdc   :  { %v2372_v31 = vpop.permute.xlu0 %2371 }
0x1bdd   :  { %v2374_v26 = vmul.f32 %v2372_v31, %v2269_v40 }
0x1be6   :  { %v2832_v33 = vpop.eup %2831 }
0x1be7   :  { %2739 = vmatmul.mubr.msk.f32.vlgmr.msra.gmra.mxu0 %vm734_vm6, %v2832_v33 }
0x1ca7   :  { %v2356_v61 = vpop.f32.mrf.mxu0 }
0x1ca8   :  { %2833 = vlog2.f32 %v2356_v61 }
0x1ca9   :  { %v2740_v27 = vpop.f32.mrf.mxu0 }
0x1cb5   :  { %v2834_v53 = vpop.eup %2833 }
0x1cb6   :  { %v2362_v44 = vmul.f32 0.6931472, %v2834_v53 }
0x1cb8   :  { %v2363_v46 = vadd.f32 %v2362_v44, %v2360_v43 }
0x1cba   :  { %v2364_v5 = vadd.f32 %v2363_v46, %v3526_v10 }
0x1cbc   :  { %v2369_v55 = vmul.f32 %v2367_v48, %v2364_v5 }
0x1cbe   :  { %v2375_v32 = vadd.f32 %v2374_v26, %v2369_v55 }
0x1cc0   :  { %v2376_v2 = vadd.f32 %v2375_v32, %v1589_v59 }
0x1cc2   :  { %v2377_v18 = vsel %vm1591_vm11, %v2376_v2, -inf }
0x1cc3   :  { %2378 = vmax.xlane.f32.xlu1 %v2377_v18 }
0x1cd4   :  { %741 = vperm.xlu1 %2784, %v737_v6  }
0x1cd8   :  { %1460 = vperm.xlu1 %2784, %v2447_v34  }
0x1d4c   :  { %v3598_v10 = vpop.xlane.xlu1 %2378 }
0x1d4d   :  { %v2380_v15 = vsub.f32 %v2376_v2, %v3598_v10 }
0x1d4f   :  { %v2381_v57 = vmul.f32 1.442695, %v2380_v15 }
0x1d50   :  { %v742_v14 = vpop.permute.xlu1 %741 }
0x1d51   :  { %2835 = vpow2.f32 %v2381_v57  ;;  %v744_v30 = vmul.f32 %v742_v14, %v738_v3  ;;  %v836_v50 = vrot.slane %v742_v14, 1 }
0x1d53   :  { %v745_v16 = vsel %vm734_vm6, %v744_v30, 0.0  ;;  %v838_v36 = vmul.f32 %v836_v50, %v835_v51 }
0x1d54   :  { %746 = vadd.xlane.f32.xlu1 %v745_v16  ;;  %v1461_v45 = vpop.permute.xlu1 %1460 }
0x1d55   :  { %v840_v19 = vsel %vm839_vm12, %v838_v36, 0.0  ;;  %v1463_v12 = vmul.f32 %v1461_v45, %v1457_v37  ;;  %v1551_v20 = vrot.slane %v1461_v45, 1 }
0x1d57   :  { %v1464_v4 = vsel %vm734_vm6, %v1463_v12, 0.0  ;;  %v1553_v60 = vmul.f32 %v1551_v20, %v1550_v11 }
0x1d59   :  { %v1554_v22 = vsel %vm839_vm12, %v1553_v60, 0.0 }
0x1d5e   :  { %v2836_v35 = vpop.eup %2835 }
0x1d5f   :  { %v2383_v7 = vsel %vm1591_vm11, %v2836_v35, 0.0 }
0x1d60   :  { %2384 = vadd.xlane.f32.xlu0 %v2383_v7 }
0x1d64   :  { %841 = vadd.xlane.f32.xlu0 %v840_v19 }
0x1d68   :  { %859 = vadd.xlane.f32.xlu0 %v858_v42 }
0x1d6c   :  { %1465 = vadd.xlane.f32.xlu0 %v1464_v4 }
0x1d70   :  { %1555 = vadd.xlane.f32.xlu0 %v1554_v22 }
0x1d74   :  { %1572 = vadd.xlane.f32.xlu0 %v1571_v41 }
0x1d78   :  { %1593 = vadd.xlane.f32.xlu0 %v1592_v62 }
0x1ddd   :  { %v747_v1 = vpop.xlane.xlu1 %746 }
0x1dde   :  { %v748_v13 = vrot.slane %v747_v1, 4 }
0x1de0   :  { %v749_v25 = vadd.f32 %v748_v13, %v747_v1 }
0x1de2   :  { %v750_v29 = vrot.slane %v749_v25, 2 }
0x1de4   :  { %v751_v17 = vadd.f32 %v750_v29, %v749_v25 }
0x1de6   :  { %v752_v39 = vrot.slane %v751_v17, 1 }
0x1de8   :  { %v753_v40 = vadd.f32 %v752_v39, %v751_v17 }
0x1de9   :  { %v2385_v21 = vpop.xlane.xlu0 %2384 }
0x1dea   :  { %2837 = vlog2.f32 %v2385_v21  ;;  %2743 = vpush %v753_v40 }
0x1ded   :  { %v842_v24 = vpop.xlane.xlu0 %841 }
0x1dee   :  { %v843_v9 = vrot.slane %v842_v24, 4 }
0x1df0   :  { %v844_v38 = vadd.f32 %v843_v9, %v842_v24 }
0x1df1   :  { %v860_v33 = vpop.xlane.xlu0 %859 }
0x1df2   :  { %v845_v58 = vrot.slane %v844_v38, 2  ;;  %v861_v61 = vrot.slane %v860_v33, 4 }
0x1df4   :  { %v862_v27 = vadd.f32 %v861_v61, %v860_v33  ;;  %v846_v53 = vadd.f32 %v845_v58, %v844_v38 }
0x1df5   :  { %v1466_v43 = vpop.xlane.xlu0 %1465 }
0x1df6   :  { %v863_v44 = vrot.slane %v862_v27, 2  ;;  %v1467_v46 = vrot.slane %v1466_v43, 4  ;;  %v847_v31 = vrot.slane %v846_v53, 1 }
0x1df7   :  { %v2838_v48 = vpop.eup %2837 }
0x1df8   :  { %v2387_v5 = vmul.f32 0.6931472, %v2838_v48  ;;  %v1468_v26 = vadd.f32 %v1467_v46, %v1466_v43  ;;  %v848_v55 = vadd.f32 %v847_v31, %v846_v53  ;;  %v864_v59 = vadd.f32 %v863_v44, %v862_v27 }
0x1df9   :  { %v1556_v32 = vpop.xlane.xlu0 %1555 }
0x1dfa   :  { %v1469_v2 = vrot.slane %v1468_v26, 2  ;;  %v1557_v18 = vrot.slane %v1556_v32, 4  ;;  %2745 = vpush %v848_v55  ;;  %v2388_v6 = vadd.f32 %v2387_v5, %v3598_v10  ;;  %v865_v34 = vrot.slane %v864_v59, 1 }
0x1dfc   :  { %v1558_v15 = vadd.f32 %v1557_v18, %v1556_v32  ;;  %v2390_v57 = vsel %vm2389_vm14, %v2388_v6, 0.0  ;;  %v866_v3 = vadd.f32 %v865_v34, %v864_v59  ;;  %v1470_v14 = vadd.f32 %v1469_v2, %v1468_v26 }
0x1dfd   :  { %2391 = vadd.xlane.f32.xlu0 %v2390_v57  ;;  %v1573_v30 = vpop.xlane.xlu0 %1572 }
0x1dfe   :  { %v1559_v16 = vrot.slane %v1558_v15, 2  ;;  %v1574_v56 = vrot.slane %v1573_v30, 4  ;;  %2747 = vpush %v866_v3  ;;  %v1471_v49 = vrot.slane %v1470_v14, 1 }
0x1e00   :  { %v1575_v50 = vadd.f32 %v1574_v56, %v1573_v30  ;;  %v1472_v51 = vadd.f32 %v1471_v49, %v1470_v14  ;;  %v1560_v52 = vadd.f32 %v1559_v16, %v1558_v15 }
0x1e01   :  { %v1594_v35 = vpop.xlane.xlu0 %1593 }
0x1e02   :  { %v1576_v7 = vrot.slane %v1575_v50, 2  ;;  %v1595_v36 = vrot.slane %v1594_v35, 4  ;;  %2749 = vpush %v1472_v51  ;;  %v1561_v28 = vrot.slane %v1560_v52, 1 }
0x1e04   :  { %v1596_v10 = vadd.f32 %v1595_v36, %v1594_v35  ;;  %v1562_v19 = vadd.f32 %v1561_v28, %v1560_v52  ;;  %v1577_v45 = vadd.f32 %v1576_v7, %v1575_v50 }
0x1e06   :  { %v1597_v8 = vrot.slane %v1596_v10, 2  ;;  %2751 = vpush %v1562_v19  ;;  %v1578_v37 = vrot.slane %v1577_v45, 1 }
0x1e08   :  { %v1579_v42 = vadd.f32 %v1578_v37, %v1577_v45  ;;  %v1598_v0 = vadd.f32 %v1597_v8, %v1596_v10 }
0x1e0a   :  { %2753 = vpush %v1579_v42  ;;  %v1599_v12 = vrot.slane %v1598_v0, 1 }
0x1e0c   :  { %v1600_v20 = vadd.f32 %v1599_v12, %v1598_v0 }
0x1e0e   :  { %2755 = vpush %v1600_v20 }
0x1e1b   :  { %s2744_s4 = spop %2743 }
0x1e1c   :  { %v755_v23 = vstv %s2744_s4 }
0x1e2b   :  { %s2746_s9 = spop %2745 }
0x1e2c   :  { %v850_v41 = vstv %s2746_s9 }
0x1e2d   :  { %v870_v1 = vadd.f32 %v850_v41, %v755_v23 }
0x1e2f   :  { %s2748_s10 = spop %2747 }
0x1e30   :  { %v868_v62 = vstv %s2748_s10 }
0x1e31   :  { %v871_v25 = vadd.f32 %v870_v1, %v868_v62 }
0x1e33   :  { %s2750_s8 = spop %2749 }
0x1e34   :  { %v1474_v13 = vstv %s2750_s8 }
0x1e35   :  { %v1582_v17 = vadd.f32 %v1474_v13, %v871_v25 }
0x1e37   :  { %s2752_s24 = spop %2751 }
0x1e38   :  { %v1564_v29 = vstv %s2752_s24 }
0x1e39   :  { %v1583_v40 = vadd.f32 %v1582_v17, %v1564_v29 }
0x1e3b   :  { %s2754_s25 = spop %2753 }
0x1e3c   :  { %v1581_v39 = vstv %s2754_s25 }
0x1e3d   :  { %v1584_v24 = vadd.f32 %v1583_v40, %v1581_v39 }
0x1e3f   :  { %s2756_s26 = spop %2755 }
0x1e40   :  { %v1602_v21 = vstv %s2756_s26 }
0x1e41   :  { %v1603_v9 = vadd.f32 %v1602_v21, %v1584_v24 }
0x1e86   :  { %v2392_v11 = vpop.xlane.xlu0 %2391 }
0x1e87   :  { %v2393_v47 = vrot.slane %v2392_v11, 4 }
0x1e89   :  { %v2394_v4 = vadd.f32 %v2393_v47, %v2392_v11 }
0x1e8b   :  { %v2395_v60 = vrot.slane %v2394_v4, 2 }
0x1e8d   :  { %v2396_v63 = vadd.f32 %v2395_v60, %v2394_v4 }
0x1e8f   :  { %v2397_v54 = vrot.slane %v2396_v63, 1 }
0x1e91   :  { %v2398_v22 = vadd.f32 %v2397_v54, %v2396_v63 }
0x1e93   :  { %2757 = vpush %v2398_v22 }
0x1ec4   :  { %s2758_s11 = spop %2757 }
0x1ec5   :  { %v2400_v38 = vstv %s2758_s11 }
0x1ec6   :  { %v2401_v33 = vsub.f32 %v1603_v9, %v2400_v38 }
0x1ec8   :  { %2403 = vst.msk [vmem:[#allocation5] sm:$0x1] %vm2402_vm15, %v2401_v33 }
0x1ec9   :  { %2871 = shalt.err (!%p2868_p9)
}
0x1eca   :  { %2415 = dma.vmem_to_hbm [thread:$0]  %s2413_s1, 16, %s3644_s16, [#allocation4]  }
0x1ecb   :  { %2882 = dma.done.wait [#allocation4], 16  }
0x1ecc   :  { %2883 = vsyncadd [#allocation4], 4294967280 }
0x1ecd   :  { %2421 = vsyncpa [#allocation3], 1 }
0x1ece   :  { %2422 = vsyncpa [#allocation4], 1 }

</bundles_post_ra>
